<compile_context>
chip_gen: v6e
topology: v6e:2x2x1
jax: 0.10.0
libtpu: 0.0.40
codegen_flags: <defaults>
</compile_context>

<pallas_src>
import functools

import jax
import jax.numpy as jnp
from jax.experimental import pallas as pl
from jax.experimental.pallas import tpu as pltpu

_GN_EPS = 1e-5


def _icru_kernel(x_ref, consts_ref, sw_ref, out_ref, *, true_n):
    # x_ref     : (Bt, G, 2*cp, Npad)  Bt batch elements, all eeg groups
    # consts_ref: ((6+cp)*cp, 1)       sublane-stacked per-channel constants:
    #             [cweight | cbias | sbias | gn_w | gn_b | gwc_b | A columns]
    # sw_ref    : (cp, Npad)           per-channel-per-pixel spatial weight
    # out_ref   : (Bt, c//2, 2*Npad)   channel-shuffled output slab
    bt, g, two_cp, n_pad = x_ref.shape
    cp = two_cp // 2
    up = cp // 2                      # CRU alpha = 1/2
    low = cp - up
    half_g = g // 2
    inv_n = 1.0 / true_n

    # ---- hoisted per-channel constants (sublane slices, emitted once) ----
    def vec(k):                       # -> (1, 1, cp, 1)
        return consts_ref[k * cp:(k + 1) * cp, :].reshape(1, 1, cp, 1)

    cw, cb, sb, gnw, gnb, gwcb = (vec(k) for k in range(6))
    a_cols = [vec(6 + i) for i in range(cp)]      # fused 1x1-conv columns

    x0 = x_ref[:, :, :cp, :]          # (Bt, G, cp, Npad)  first chunk / group
    x1 = x_ref[:, :, cp:, :]          # (Bt, G, cp, Npad)  second chunk / group

    def cru(z):
        # y1 = A1 @ z[:, :, :up] + gwc_b ; y2 = A2 @ z[:, :, up:]
        # Contraction dims are tiny (cp//2) -> VPU broadcast-MACs, no MXU.
        y1 = a_cols[0] * z[:, :, 0:1, :]
        for i in range(1, up):
            y1 = y1 + a_cols[i] * z[:, :, i:i + 1, :]
        y2 = a_cols[up] * z[:, :, up:up + 1, :]
        for i in range(1, low):
            y2 = y2 + a_cols[up + i] * z[:, :, up + i:up + i + 1, :]

        # adaptive avg pool (1,1) + joint softmax over the 2*cp channels.
        # GWC bias is added analytically to the pooled mean so zero-padded
        # lanes (when Npad > true_n) never pollute the reduction.
        p1 = jnp.sum(y1, axis=-1, keepdims=True) * inv_n + gwcb   # (Bt,G,cp,1)
        p2 = jnp.sum(y2, axis=-1, keepdims=True) * inv_n
        y1 = y1 + gwcb
        m = jnp.maximum(jnp.max(p1, axis=2, keepdims=True),
                        jnp.max(p2, axis=2, keepdims=True))       # (Bt,G,1,1)
        e1 = jnp.exp(p1 - m)
        e2 = jnp.exp(p2 - m)
        denom = (jnp.sum(e1, axis=2, keepdims=True)
                 + jnp.sum(e2, axis=2, keepdims=True))            # (Bt,G,1,1)
        inv_d = pl.reciprocal(denom, approx=True)                 # EUP slot
        # CRU returns (Y1, Y2, Y1 + Y2); ICRU consumes index [2].
        return (e1 * inv_d) * y1 + (e2 * inv_d) * y2              # (Bt,G,cp,Npad)

    def store_shuffled(y, ch_off):
        # fused torch.cat([yn, ys], 1) + channel_shuffle(groups=2): group gi
        # lands at rows (gi % (G//2))*2cp (+cp for ys) and lane block
        # gi // (G//2) of the (c//2, 2*Npad) shuffled output slab.
        for gi in range(g):
            row = (gi % half_g) * two_cp + ch_off
            col0 = (gi // half_g) * n_pad
            out_ref[:, row:row + cp, col0:col0 + n_pad] = y[:, gi]

    # ---- channel-attention branch on x_0 ----
    pool0 = jnp.sum(x0, axis=-1, keepdims=True) * inv_n           # avg pool
    xn = x0 * jax.nn.sigmoid(cw * pool0 + cb)
    store_shuffled(cru(xn), 0)        # write yn now -> bounds live ranges

    # ---- spatial branch on x_1 (GroupNorm: one channel per group) ----
    s1 = jnp.sum(x1, axis=-1, keepdims=True)                      # back-to-back
    s2 = jnp.sum(x1 * x1, axis=-1, keepdims=True)                 # lane reduces
    mean = s1 * inv_n
    var = s2 * inv_n - mean * mean                                # E[x^2]-mean^2
    xg = (x1 - mean) * jax.lax.rsqrt(var + _GN_EPS) * gnw + gnb
    sw = sw_ref[...].reshape(1, 1, cp, n_pad)
    xs = x1 * jax.nn.sigmoid(sw * xg + sb)
    store_shuffled(cru(xs), cp)


def _pick_bt(b, per_batch_bytes, budget_bytes=12 * 2 ** 20):
    """Largest divisor of b whose working set fits the VMEM budget, preferring
    >= 2 grid steps (pipeline overlap + v7x dual-TensorCore sharding)."""
    divisors = [d for d in range(1, b + 1) if b % d == 0]
    fits = [d for d in divisors if d * per_batch_bytes <= budget_bytes]
    if not fits:
        return 1
    multi = [d for d in fits if b // d >= 2]
    return max(multi) if multi else max(fits)


def icru_forward(x, params, *, eeg_groups):
    b, c, h, w = x.shape
    g = eeg_groups
    assert g % 2 == 0, "channel-shuffle fusion assumes an even eeg_groups"
    cp = c // (2 * g)
    n = h * w
    n_pad = ((n + 127) // 128) * 128          # lane-dense last dim

    # layout glue: (b, c, h, w) -> (b, g, 2*cp, n); pad pixels to 128 lanes.
    xr = x.reshape(b, g, 2 * cp, n)
    sw = params["sweight"]
    if n_pad != n:
        xr = jnp.pad(xr, ((0, 0), (0, 0), (0, 0), (0, n_pad - n)))
        sw = jnp.pad(sw, ((0, 0), (0, n_pad - n)))

    # Fold the squeeze 1x1 convs into the expand 1x1 convs (parameter algebra):
    #   y1 = (GWC_dense + PWC1) @ (SQ1 @ up) + gwc_b = A1 @ up + gwc_b
    #   y2 = [[PWC2]; [I]] @ (SQ2 @ low)             = A2 @ low
    low_s = params["sq2_w"].shape[0]
    a1 = (params["gwc_w"] + params["pwc1_w"]) @ params["sq1_w"]        # (cp, up)
    w2 = jnp.concatenate(
        [params["pwc2_w"], jnp.eye(low_s, dtype=jnp.float32)], axis=0)  # (cp, low_s)
    a2 = w2 @ params["sq2_w"]                                           # (cp, low)
    a_pack = jnp.concatenate([a1, a2], axis=1)                          # (cp, cp)

    # Sublane-stacked per-channel constants: 6 scalar vectors + cp A-columns.
    consts = jnp.concatenate(
        [params["cweight"], params["cbias"], params["sbias"],
         params["gn_w"], params["gn_b"], params["gwc_b"],
         a_pack.T.reshape(cp * cp, 1)], axis=0).astype(jnp.float32)     # ((6+cp)*cp,1)

    # Batch blocking: double-buffered in/out blocks + ~8 live (g,cp,n) f32
    # temporaries per batch element, kept under a conservative cross-chip budget.
    per_batch_bytes = 16 * g * cp * n_pad * 4
    bt = _pick_bt(b, per_batch_bytes)

    # TODO(synk): when cp % 16 == 0 and the consumer tolerates bf16, make the
    # HBM-facing x / output bf16 (halves DMA bytes; biggest win on v5e/v6e).

    out = pl.pallas_call(
        functools.partial(_icru_kernel, true_n=n),
        out_shape=jax.ShapeDtypeStruct((b, c // 2, 2 * n_pad), jnp.float32),
        grid=(b // bt,),
        in_specs=[
            pl.BlockSpec((bt, g, 2 * cp, n_pad), lambda i: (i, 0, 0, 0)),
            pl.BlockSpec(((6 + cp) * cp, 1), lambda i: (0, 0)),
            pl.BlockSpec((cp, n_pad), lambda i: (0, 0)),
        ],
        out_specs=pl.BlockSpec((bt, c // 2, 2 * n_pad), lambda i: (i, 0, 0)),
        compiler_params=pltpu.CompilerParams(
            dimension_semantics=("parallel",)),
    )(xr, consts, sw)

    # The kernel already wrote channels in channel_shuffle(., 2) order.
    if n_pad == n:
        return out.reshape(b, c, h, w)            # pure contiguous view
    return out.reshape(b, c // 2, 2, n_pad)[..., :n].reshape(b, c, h, w)


def init_params(channels, eeg_groups, size, key):
    """Deterministic parameter init.

    cweight/sweight/cbias/sbias and GroupNorm affine follow the module's
    __init__ (zeros / ones); conv weights get small deterministic randoms.
    """
    cp = channels // (2 * eeg_groups)
    up = cp // 2
    low = cp - up
    up_s = up // 2                      # squeeze_radio = 2
    low_s = low // 2
    h, w = size
    n = h * w

    ks = jax.random.split(key, 6)

    def rnd(k, shape):
        return 0.1 * jax.random.normal(k, shape, dtype=jnp.float32)

    sq1_w = rnd(ks[0], (up_s, up))                       # squeeze1 (1x1, no bias)
    sq2_w = rnd(ks[1], (low_s, low))                     # squeeze2 (1x1, no bias)
    gwc_scalar = rnd(ks[2], (cp,))                       # grouped 1x1: 1 scalar/out ch
    gwc_b = rnd(ks[3], (cp, 1))                          # GWC bias (default bias=True)
    pwc1_w = rnd(ks[4], (cp, up_s))                      # PWC1 (1x1, no bias)
    pwc2_w = rnd(ks[5], (cp - low_s, low_s))             # PWC2 (1x1, no bias)

    # Expand grouped GWC conv into a dense block-diagonal (cp, up_s) matrix.
    out_per_group = cp // up_s
    group_of_out = jnp.arange(cp) // out_per_group
    gwc_w = jnp.zeros((cp, up_s), jnp.float32).at[
        jnp.arange(cp), group_of_out].set(gwc_scalar)

    return {
        "cweight": jnp.zeros((cp, 1), jnp.float32),
        "cbias": jnp.ones((cp, 1), jnp.float32),
        "sweight": jnp.zeros((cp, n), jnp.float32),
        "sbias": jnp.ones((cp, 1), jnp.float32),
        "gn_w": jnp.ones((cp, 1), jnp.float32),
        "gn_b": jnp.zeros((cp, 1), jnp.float32),
        "sq1_w": sq1_w, "sq2_w": sq2_w,
        "gwc_w": gwc_w, "gwc_b": gwc_b,
        "pwc1_w": pwc1_w, "pwc2_w": pwc2_w,
    }


def icru_reference(x, params, *, eeg_groups):
    """Pure-JAX reference mirroring the PyTorch forward (unfused path)."""
    b, c, h, w = x.shape
    cp = c // (2 * eeg_groups)
    up_ch = cp // 2
    bg = b * eeg_groups
    n = h * w
    xr = x.reshape(bg, 2 * cp, n)
    x0, x1 = xr[:, :cp], xr[:, cp:]

    def mm(wm, z):
        return jnp.einsum("oi,bin->bon", wm, z)

    def cru(z):
        up, low = z[:, :up_ch], z[:, up_ch:]
        up_s = mm(params["sq1_w"], up)
        low_s = mm(params["sq2_w"], low)
        y1 = mm(params["gwc_w"], up_s) + params["gwc_b"][None] + mm(params["pwc1_w"], up_s)
        y2 = jnp.concatenate([mm(params["pwc2_w"], low_s), low_s], axis=1)
        both = jnp.concatenate([y1, y2], axis=1)
        sm = jax.nn.softmax(both.mean(axis=-1, keepdims=True), axis=1)
        both = sm * both
        return both[:, :cp] + both[:, cp:]

    pool0 = x0.mean(-1, keepdims=True)
    xn = x0 * jax.nn.sigmoid(params["cweight"][None] * pool0 + params["cbias"][None])
    yn = cru(xn)

    mean = x1.mean(-1, keepdims=True)
    var = ((x1 - mean) ** 2).mean(-1, keepdims=True)
    xg = (x1 - mean) * jax.lax.rsqrt(var + _GN_EPS) * params["gn_w"][None] + params["gn_b"][None]
    xs = x1 * jax.nn.sigmoid(params["sweight"][None] * xg + params["sbias"][None])
    ys = cru(xs)

    out = jnp.concatenate([yn, ys], axis=1).reshape(b, c, h, w)
    out = jnp.transpose(out.reshape(b, 2, c // 2, h, w),
                        (0, 2, 1, 3, 4)).reshape(b, c, h, w)
    return out


if __name__ == "__main__":
    b, channels, h, w = 2, 64, 16, 16
    eeg_groups = 4

    key = jax.random.PRNGKey(0)
    kx, kp = jax.random.split(key)
    x = jax.random.normal(kx, (b, channels, h, w), dtype=jnp.float32)
    params = init_params(channels, eeg_groups, (h, w), kp)

    out = icru_forward(x, params, eeg_groups=eeg_groups)
    out = jax.block_until_ready(out)

    ref = icru_reference(x, params, eeg_groups=eeg_groups)
    assert out.shape == (b, channels, h, w)
    assert bool(jnp.allclose(out, ref, atol=1e-3, rtol=1e-3)), "mismatch vs JAX reference"

    print("KERNEL_OK")
</pallas_src>

<mosaic_0001>
module attributes {stable_mosaic.version = 11 : i64} {
  func.func @_icru_kernel(%arg0: i32, %arg1: memref<1x4x16x256xf32, #tpu.memory_space<vmem>>, %arg2: memref<112x1xf32, #tpu.memory_space<vmem>>, %arg3: memref<8x256xf32, #tpu.memory_space<vmem>>, %arg4: memref<1x32x512xf32, #tpu.memory_space<vmem>>) attributes {dimension_semantics = [#tpu.dimension_semantics<parallel>], iteration_bounds = array<i64: 2>, scalar_prefetch = 0 : i64, scratch_operands = 0 : i64, tpu.core_type = #tpu.core_type<tc>, window_params = [{transform_indices = @transform_0, window_bounds = array<i64: 1, 4, 16, 256>}, {pipeline_mode = #tpu.pipeline_mode<synchronous>, transform_indices = @transform_1, window_bounds = array<i64: 112, 1>}, {pipeline_mode = #tpu.pipeline_mode<synchronous>, transform_indices = @transform_2, window_bounds = array<i64: 8, 256>}, {transform_indices = @transform_3, window_bounds = array<i64: 1, 32, 512>}]} {
    %c0 = arith.constant 0 : index
    %c0_0 = arith.constant 0 : index
    %0 = vector.load %arg2[%c0, %c0_0] : memref<112x1xf32, #tpu.memory_space<vmem>>, vector<8x1xf32>
    %1 = vector.shape_cast %0 : vector<8x1xf32> to vector<1x1x8x1xf32>
    %c8 = arith.constant 8 : index
    %c0_1 = arith.constant 0 : index
    %2 = vector.load %arg2[%c8, %c0_1] : memref<112x1xf32, #tpu.memory_space<vmem>>, vector<8x1xf32>
    %3 = vector.shape_cast %2 : vector<8x1xf32> to vector<1x1x8x1xf32>
    %c16 = arith.constant 16 : index
    %c0_2 = arith.constant 0 : index
    %4 = vector.load %arg2[%c16, %c0_2] : memref<112x1xf32, #tpu.memory_space<vmem>>, vector<8x1xf32>
    %5 = vector.shape_cast %4 : vector<8x1xf32> to vector<1x1x8x1xf32>
    %c24 = arith.constant 24 : index
    %c0_3 = arith.constant 0 : index
    %6 = vector.load %arg2[%c24, %c0_3] : memref<112x1xf32, #tpu.memory_space<vmem>>, vector<8x1xf32>
    %7 = vector.shape_cast %6 : vector<8x1xf32> to vector<1x1x8x1xf32>
    %c32 = arith.constant 32 : index
    %c0_4 = arith.constant 0 : index
    %8 = vector.load %arg2[%c32, %c0_4] : memref<112x1xf32, #tpu.memory_space<vmem>>, vector<8x1xf32>
    %9 = vector.shape_cast %8 : vector<8x1xf32> to vector<1x1x8x1xf32>
    %c40 = arith.constant 40 : index
    %c0_5 = arith.constant 0 : index
    %10 = vector.load %arg2[%c40, %c0_5] : memref<112x1xf32, #tpu.memory_space<vmem>>, vector<8x1xf32>
    %11 = vector.shape_cast %10 : vector<8x1xf32> to vector<1x1x8x1xf32>
    %c48 = arith.constant 48 : index
    %c0_6 = arith.constant 0 : index
    %12 = vector.load %arg2[%c48, %c0_6] : memref<112x1xf32, #tpu.memory_space<vmem>>, vector<8x1xf32>
    %13 = vector.shape_cast %12 : vector<8x1xf32> to vector<1x1x8x1xf32>
    %c56 = arith.constant 56 : index
    %c0_7 = arith.constant 0 : index
    %14 = vector.load %arg2[%c56, %c0_7] : memref<112x1xf32, #tpu.memory_space<vmem>>, vector<8x1xf32>
    %15 = vector.shape_cast %14 : vector<8x1xf32> to vector<1x1x8x1xf32>
    %c64 = arith.constant 64 : index
    %c0_8 = arith.constant 0 : index
    %16 = vector.load %arg2[%c64, %c0_8] : memref<112x1xf32, #tpu.memory_space<vmem>>, vector<8x1xf32>
    %17 = vector.shape_cast %16 : vector<8x1xf32> to vector<1x1x8x1xf32>
    %c72 = arith.constant 72 : index
    %c0_9 = arith.constant 0 : index
    %18 = vector.load %arg2[%c72, %c0_9] : memref<112x1xf32, #tpu.memory_space<vmem>>, vector<8x1xf32>
    %19 = vector.shape_cast %18 : vector<8x1xf32> to vector<1x1x8x1xf32>
    %c80 = arith.constant 80 : index
    %c0_10 = arith.constant 0 : index
    %20 = vector.load %arg2[%c80, %c0_10] : memref<112x1xf32, #tpu.memory_space<vmem>>, vector<8x1xf32>
    %21 = vector.shape_cast %20 : vector<8x1xf32> to vector<1x1x8x1xf32>
    %c88 = arith.constant 88 : index
    %c0_11 = arith.constant 0 : index
    %22 = vector.load %arg2[%c88, %c0_11] : memref<112x1xf32, #tpu.memory_space<vmem>>, vector<8x1xf32>
    %23 = vector.shape_cast %22 : vector<8x1xf32> to vector<1x1x8x1xf32>
    %c96 = arith.constant 96 : index
    %c0_12 = arith.constant 0 : index
    %24 = vector.load %arg2[%c96, %c0_12] : memref<112x1xf32, #tpu.memory_space<vmem>>, vector<8x1xf32>
    %25 = vector.shape_cast %24 : vector<8x1xf32> to vector<1x1x8x1xf32>
    %c104 = arith.constant 104 : index
    %c0_13 = arith.constant 0 : index
    %26 = vector.load %arg2[%c104, %c0_13] : memref<112x1xf32, #tpu.memory_space<vmem>>, vector<8x1xf32>
    %27 = vector.shape_cast %26 : vector<8x1xf32> to vector<1x1x8x1xf32>
    %c0_14 = arith.constant 0 : index
    %c0_15 = arith.constant 0 : index
    %c0_16 = arith.constant 0 : index
    %c0_17 = arith.constant 0 : index
    %28 = vector.load %arg1[%c0_14, %c0_15, %c0_16, %c0_17] : memref<1x4x16x256xf32, #tpu.memory_space<vmem>>, vector<1x4x8x256xf32>
    %c0_18 = arith.constant 0 : index
    %c0_19 = arith.constant 0 : index
    %c8_20 = arith.constant 8 : index
    %c0_21 = arith.constant 0 : index
    %29 = vector.load %arg1[%c0_18, %c0_19, %c8_20, %c0_21] : memref<1x4x16x256xf32, #tpu.memory_space<vmem>>, vector<1x4x8x256xf32>
    %cst = arith.constant dense<0.000000e+00> : vector<1x4x8xf32>
    %30 = vector.multi_reduction <add>, %28, %cst [3] : vector<1x4x8x256xf32> to vector<1x4x8xf32>
    %31 = vector.shape_cast %30 : vector<1x4x8xf32> to vector<1x4x8x1xf32>
    %cst_22 = arith.constant 3.906250e-03 : f32
    %32 = vector.broadcast %cst_22 : f32 to vector<1x4x8x1xf32>
    %33 = arith.mulf %31, %32 : vector<1x4x8x1xf32>
    %34 = vector.broadcast %1 : vector<1x1x8x1xf32> to vector<1x4x8x1xf32>
    %35 = arith.mulf %34, %33 : vector<1x4x8x1xf32>
    %36 = vector.broadcast %3 : vector<1x1x8x1xf32> to vector<1x4x8x1xf32>
    %37 = arith.addf %35, %36 : vector<1x4x8x1xf32>
    %38 = arith.negf %37 : vector<1x4x8x1xf32>
    %39 = math.exp %38 : vector<1x4x8x1xf32>
    %cst_23 = arith.constant 1.000000e+00 : f32
    %40 = vector.broadcast %cst_23 : f32 to vector<1x4x8x1xf32>
    %41 = arith.addf %40, %39 : vector<1x4x8x1xf32>
    %42 = arith.divf %40, %41 : vector<1x4x8x1xf32>
    %43 = vector.broadcast %42 : vector<1x4x8x1xf32> to vector<1x4x8x256xf32>
    %44 = arith.mulf %28, %43 : vector<1x4x8x256xf32>
    %45 = vector.extract_strided_slice %44 {offsets = [0, 0, 0, 0], sizes = [1, 4, 1, 256], strides = [1, 1, 1, 1]} : vector<1x4x8x256xf32> to vector<1x4x1x256xf32>
    %46 = vector.broadcast %13 : vector<1x1x8x1xf32> to vector<1x4x8x256xf32>
    %47 = vector.broadcast %45 : vector<1x4x1x256xf32> to vector<1x4x8x256xf32>
    %48 = arith.mulf %46, %47 : vector<1x4x8x256xf32>
    %49 = vector.extract_strided_slice %44 {offsets = [0, 0, 1, 0], sizes = [1, 4, 1, 256], strides = [1, 1, 1, 1]} : vector<1x4x8x256xf32> to vector<1x4x1x256xf32>
    %50 = vector.broadcast %15 : vector<1x1x8x1xf32> to vector<1x4x8x256xf32>
    %51 = vector.broadcast %49 : vector<1x4x1x256xf32> to vector<1x4x8x256xf32>
    %52 = arith.mulf %50, %51 : vector<1x4x8x256xf32>
    %53 = arith.addf %48, %52 : vector<1x4x8x256xf32>
    %54 = vector.extract_strided_slice %44 {offsets = [0, 0, 2, 0], sizes = [1, 4, 1, 256], strides = [1, 1, 1, 1]} : vector<1x4x8x256xf32> to vector<1x4x1x256xf32>
    %55 = vector.broadcast %17 : vector<1x1x8x1xf32> to vector<1x4x8x256xf32>
    %56 = vector.broadcast %54 : vector<1x4x1x256xf32> to vector<1x4x8x256xf32>
    %57 = arith.mulf %55, %56 : vector<1x4x8x256xf32>
    %58 = arith.addf %53, %57 : vector<1x4x8x256xf32>
    %59 = vector.extract_strided_slice %44 {offsets = [0, 0, 3, 0], sizes = [1, 4, 1, 256], strides = [1, 1, 1, 1]} : vector<1x4x8x256xf32> to vector<1x4x1x256xf32>
    %60 = vector.broadcast %19 : vector<1x1x8x1xf32> to vector<1x4x8x256xf32>
    %61 = vector.broadcast %59 : vector<1x4x1x256xf32> to vector<1x4x8x256xf32>
    %62 = arith.mulf %60, %61 : vector<1x4x8x256xf32>
    %63 = arith.addf %58, %62 : vector<1x4x8x256xf32>
    %64 = vector.extract_strided_slice %44 {offsets = [0, 0, 4, 0], sizes = [1, 4, 1, 256], strides = [1, 1, 1, 1]} : vector<1x4x8x256xf32> to vector<1x4x1x256xf32>
    %65 = vector.broadcast %21 : vector<1x1x8x1xf32> to vector<1x4x8x256xf32>
    %66 = vector.broadcast %64 : vector<1x4x1x256xf32> to vector<1x4x8x256xf32>
    %67 = arith.mulf %65, %66 : vector<1x4x8x256xf32>
    %68 = vector.extract_strided_slice %44 {offsets = [0, 0, 5, 0], sizes = [1, 4, 1, 256], strides = [1, 1, 1, 1]} : vector<1x4x8x256xf32> to vector<1x4x1x256xf32>
    %69 = vector.broadcast %23 : vector<1x1x8x1xf32> to vector<1x4x8x256xf32>
    %70 = vector.broadcast %68 : vector<1x4x1x256xf32> to vector<1x4x8x256xf32>
    %71 = arith.mulf %69, %70 : vector<1x4x8x256xf32>
    %72 = arith.addf %67, %71 : vector<1x4x8x256xf32>
    %73 = vector.extract_strided_slice %44 {offsets = [0, 0, 6, 0], sizes = [1, 4, 1, 256], strides = [1, 1, 1, 1]} : vector<1x4x8x256xf32> to vector<1x4x1x256xf32>
    %74 = vector.broadcast %25 : vector<1x1x8x1xf32> to vector<1x4x8x256xf32>
    %75 = vector.broadcast %73 : vector<1x4x1x256xf32> to vector<1x4x8x256xf32>
    %76 = arith.mulf %74, %75 : vector<1x4x8x256xf32>
    %77 = arith.addf %72, %76 : vector<1x4x8x256xf32>
    %78 = vector.extract_strided_slice %44 {offsets = [0, 0, 7, 0], sizes = [1, 4, 1, 256], strides = [1, 1, 1, 1]} : vector<1x4x8x256xf32> to vector<1x4x1x256xf32>
    %79 = vector.broadcast %27 : vector<1x1x8x1xf32> to vector<1x4x8x256xf32>
    %80 = vector.broadcast %78 : vector<1x4x1x256xf32> to vector<1x4x8x256xf32>
    %81 = arith.mulf %79, %80 : vector<1x4x8x256xf32>
    %82 = arith.addf %77, %81 : vector<1x4x8x256xf32>
    %cst_24 = arith.constant dense<0.000000e+00> : vector<1x4x8xf32>
    %83 = vector.multi_reduction <add>, %63, %cst_24 [3] : vector<1x4x8x256xf32> to vector<1x4x8xf32>
    %84 = vector.shape_cast %83 : vector<1x4x8xf32> to vector<1x4x8x1xf32>
    %cst_25 = arith.constant 3.906250e-03 : f32
    %85 = vector.broadcast %cst_25 : f32 to vector<1x4x8x1xf32>
    %86 = arith.mulf %84, %85 : vector<1x4x8x1xf32>
    %87 = vector.broadcast %11 : vector<1x1x8x1xf32> to vector<1x4x8x1xf32>
    %88 = arith.addf %86, %87 : vector<1x4x8x1xf32>
    %cst_26 = arith.constant dense<0.000000e+00> : vector<1x4x8xf32>
    %89 = vector.multi_reduction <add>, %82, %cst_26 [3] : vector<1x4x8x256xf32> to vector<1x4x8xf32>
    %90 = vector.shape_cast %89 : vector<1x4x8xf32> to vector<1x4x8x1xf32>
    %cst_27 = arith.constant 3.906250e-03 : f32
    %91 = vector.broadcast %cst_27 : f32 to vector<1x4x8x1xf32>
    %92 = arith.mulf %90, %91 : vector<1x4x8x1xf32>
    %93 = vector.broadcast %11 : vector<1x1x8x1xf32> to vector<1x4x8x256xf32>
    %94 = arith.addf %63, %93 : vector<1x4x8x256xf32>
    %cst_28 = arith.constant dense<0xFF800000> : vector<1x4x1xf32>
    %95 = vector.multi_reduction <maximumf>, %88, %cst_28 [2] : vector<1x4x8x1xf32> to vector<1x4x1xf32>
    %96 = vector.shape_cast %95 : vector<1x4x1xf32> to vector<1x4x1x1xf32>
    %cst_29 = arith.constant dense<0xFF800000> : vector<1x4x1xf32>
    %97 = vector.multi_reduction <maximumf>, %92, %cst_29 [2] : vector<1x4x8x1xf32> to vector<1x4x1xf32>
    %98 = vector.shape_cast %97 : vector<1x4x1xf32> to vector<1x4x1x1xf32>
    %99 = arith.maximumf %96, %98 : vector<1x4x1x1xf32>
    %100 = vector.broadcast %99 : vector<1x4x1x1xf32> to vector<1x4x8x1xf32>
    %101 = arith.subf %88, %100 : vector<1x4x8x1xf32>
    %102 = math.exp %101 : vector<1x4x8x1xf32>
    %103 = vector.broadcast %99 : vector<1x4x1x1xf32> to vector<1x4x8x1xf32>
    %104 = arith.subf %92, %103 : vector<1x4x8x1xf32>
    %105 = math.exp %104 : vector<1x4x8x1xf32>
    %cst_30 = arith.constant dense<0.000000e+00> : vector<1x4x1xf32>
    %106 = vector.multi_reduction <add>, %102, %cst_30 [2] : vector<1x4x8x1xf32> to vector<1x4x1xf32>
    %107 = vector.shape_cast %106 : vector<1x4x1xf32> to vector<1x4x1x1xf32>
    %cst_31 = arith.constant dense<0.000000e+00> : vector<1x4x1xf32>
    %108 = vector.multi_reduction <add>, %105, %cst_31 [2] : vector<1x4x8x1xf32> to vector<1x4x1xf32>
    %109 = vector.shape_cast %108 : vector<1x4x1xf32> to vector<1x4x1x1xf32>
    %110 = arith.addf %107, %109 : vector<1x4x1x1xf32>
    %111 = tpu.reciprocal %110 {approx = true} : vector<1x4x1x1xf32> -> vector<1x4x1x1xf32>
    %112 = vector.broadcast %111 : vector<1x4x1x1xf32> to vector<1x4x8x1xf32>
    %113 = arith.mulf %102, %112 : vector<1x4x8x1xf32>
    %114 = vector.broadcast %113 : vector<1x4x8x1xf32> to vector<1x4x8x256xf32>
    %115 = arith.mulf %114, %94 : vector<1x4x8x256xf32>
    %116 = vector.broadcast %111 : vector<1x4x1x1xf32> to vector<1x4x8x1xf32>
    %117 = arith.mulf %105, %116 : vector<1x4x8x1xf32>
    %118 = vector.broadcast %117 : vector<1x4x8x1xf32> to vector<1x4x8x256xf32>
    %119 = arith.mulf %118, %82 : vector<1x4x8x256xf32>
    %120 = arith.addf %115, %119 : vector<1x4x8x256xf32>
    %121 = vector.extract_strided_slice %120 {offsets = [0, 0, 0, 0], sizes = [1, 1, 8, 256], strides = [1, 1, 1, 1]} : vector<1x4x8x256xf32> to vector<1x1x8x256xf32>
    %122 = vector.shape_cast %121 : vector<1x1x8x256xf32> to vector<1x8x256xf32>
    %c0_32 = arith.constant 0 : index
    %c0_33 = arith.constant 0 : index
    %c0_34 = arith.constant 0 : index
    %123 = vector.load %arg4[%c0_32, %c0_33, %c0_34] : memref<1x32x512xf32, #tpu.memory_space<vmem>>, vector<1x8x256xf32>
    tpu.vector_store %arg4[%c0_32, %c0_33, %c0_34], %122 {strides = array<i32>} : memref<1x32x512xf32, #tpu.memory_space<vmem>>, vector<1x8x256xf32>,
    %124 = vector.extract_strided_slice %120 {offsets = [0, 1, 0, 0], sizes = [1, 1, 8, 256], strides = [1, 1, 1, 1]} : vector<1x4x8x256xf32> to vector<1x1x8x256xf32>
    %125 = vector.shape_cast %124 : vector<1x1x8x256xf32> to vector<1x8x256xf32>
    %c0_35 = arith.constant 0 : index
    %c16_36 = arith.constant 16 : index
    %c0_37 = arith.constant 0 : index
    %126 = vector.load %arg4[%c0_35, %c16_36, %c0_37] : memref<1x32x512xf32, #tpu.memory_space<vmem>>, vector<1x8x256xf32>
    tpu.vector_store %arg4[%c0_35, %c16_36, %c0_37], %125 {strides = array<i32>} : memref<1x32x512xf32, #tpu.memory_space<vmem>>, vector<1x8x256xf32>,
    %127 = vector.extract_strided_slice %120 {offsets = [0, 2, 0, 0], sizes = [1, 1, 8, 256], strides = [1, 1, 1, 1]} : vector<1x4x8x256xf32> to vector<1x1x8x256xf32>
    %128 = vector.shape_cast %127 : vector<1x1x8x256xf32> to vector<1x8x256xf32>
    %c0_38 = arith.constant 0 : index
    %c0_39 = arith.constant 0 : index
    %c256 = arith.constant 256 : index
    %129 = vector.load %arg4[%c0_38, %c0_39, %c256] : memref<1x32x512xf32, #tpu.memory_space<vmem>>, vector<1x8x256xf32>
    tpu.vector_store %arg4[%c0_38, %c0_39, %c256], %128 {strides = array<i32>} : memref<1x32x512xf32, #tpu.memory_space<vmem>>, vector<1x8x256xf32>,
    %130 = vector.extract_strided_slice %120 {offsets = [0, 3, 0, 0], sizes = [1, 1, 8, 256], strides = [1, 1, 1, 1]} : vector<1x4x8x256xf32> to vector<1x1x8x256xf32>
    %131 = vector.shape_cast %130 : vector<1x1x8x256xf32> to vector<1x8x256xf32>
    %c0_40 = arith.constant 0 : index
    %c16_41 = arith.constant 16 : index
    %c256_42 = arith.constant 256 : index
    %132 = vector.load %arg4[%c0_40, %c16_41, %c256_42] : memref<1x32x512xf32, #tpu.memory_space<vmem>>, vector<1x8x256xf32>
    tpu.vector_store %arg4[%c0_40, %c16_41, %c256_42], %131 {strides = array<i32>} : memref<1x32x512xf32, #tpu.memory_space<vmem>>, vector<1x8x256xf32>,
    %cst_43 = arith.constant dense<0.000000e+00> : vector<1x4x8xf32>
    %133 = vector.multi_reduction <add>, %29, %cst_43 [3] : vector<1x4x8x256xf32> to vector<1x4x8xf32>
    %134 = vector.shape_cast %133 : vector<1x4x8xf32> to vector<1x4x8x1xf32>
    %135 = arith.mulf %29, %29 : vector<1x4x8x256xf32>
    %cst_44 = arith.constant dense<0.000000e+00> : vector<1x4x8xf32>
    %136 = vector.multi_reduction <add>, %135, %cst_44 [3] : vector<1x4x8x256xf32> to vector<1x4x8xf32>
    %137 = vector.shape_cast %136 : vector<1x4x8xf32> to vector<1x4x8x1xf32>
    %cst_45 = arith.constant 3.906250e-03 : f32
    %138 = vector.broadcast %cst_45 : f32 to vector<1x4x8x1xf32>
    %139 = arith.mulf %134, %138 : vector<1x4x8x1xf32>
    %cst_46 = arith.constant 3.906250e-03 : f32
    %140 = vector.broadcast %cst_46 : f32 to vector<1x4x8x1xf32>
    %141 = arith.mulf %137, %140 : vector<1x4x8x1xf32>
    %142 = arith.mulf %139, %139 : vector<1x4x8x1xf32>
    %143 = arith.subf %141, %142 : vector<1x4x8x1xf32>
    %144 = vector.broadcast %139 : vector<1x4x8x1xf32> to vector<1x4x8x256xf32>
    %145 = arith.subf %29, %144 : vector<1x4x8x256xf32>
    %cst_47 = arith.constant 9.99999974E-6 : f32
    %146 = vector.broadcast %cst_47 : f32 to vector<1x4x8x1xf32>
    %147 = arith.addf %143, %146 : vector<1x4x8x1xf32>
    %148 = math.rsqrt %147 : vector<1x4x8x1xf32>
    %149 = vector.broadcast %148 : vector<1x4x8x1xf32> to vector<1x4x8x256xf32>
    %150 = arith.mulf %145, %149 : vector<1x4x8x256xf32>
    %151 = vector.broadcast %7 : vector<1x1x8x1xf32> to vector<1x4x8x256xf32>
    %152 = arith.mulf %150, %151 : vector<1x4x8x256xf32>
    %153 = vector.broadcast %9 : vector<1x1x8x1xf32> to vector<1x4x8x256xf32>
    %154 = arith.addf %152, %153 : vector<1x4x8x256xf32>
    %c0_48 = arith.constant 0 : index
    %c0_49 = arith.constant 0 : index
    %155 = vector.load %arg3[%c0_48, %c0_49] : memref<8x256xf32, #tpu.memory_space<vmem>>, vector<8x256xf32>
    %156 = vector.shape_cast %155 : vector<8x256xf32> to vector<1x1x8x256xf32>
    %157 = vector.broadcast %156 : vector<1x1x8x256xf32> to vector<1x4x8x256xf32>
    %158 = arith.mulf %157, %154 : vector<1x4x8x256xf32>
    %159 = vector.broadcast %5 : vector<1x1x8x1xf32> to vector<1x4x8x256xf32>
    %160 = arith.addf %158, %159 : vector<1x4x8x256xf32>
    %161 = arith.negf %160 : vector<1x4x8x256xf32>
    %162 = math.exp %161 : vector<1x4x8x256xf32>
    %cst_50 = arith.constant 1.000000e+00 : f32
    %163 = vector.broadcast %cst_50 : f32 to vector<1x4x8x256xf32>
    %164 = arith.addf %163, %162 : vector<1x4x8x256xf32>
    %165 = arith.divf %163, %164 : vector<1x4x8x256xf32>
    %166 = arith.mulf %29, %165 : vector<1x4x8x256xf32>
    %167 = vector.extract_strided_slice %166 {offsets = [0, 0, 0, 0], sizes = [1, 4, 1, 256], strides = [1, 1, 1, 1]} : vector<1x4x8x256xf32> to vector<1x4x1x256xf32>
    %168 = vector.broadcast %13 : vector<1x1x8x1xf32> to vector<1x4x8x256xf32>
    %169 = vector.broadcast %167 : vector<1x4x1x256xf32> to vector<1x4x8x256xf32>
    %170 = arith.mulf %168, %169 : vector<1x4x8x256xf32>
    %171 = vector.extract_strided_slice %166 {offsets = [0, 0, 1, 0], sizes = [1, 4, 1, 256], strides = [1, 1, 1, 1]} : vector<1x4x8x256xf32> to vector<1x4x1x256xf32>
    %172 = vector.broadcast %15 : vector<1x1x8x1xf32> to vector<1x4x8x256xf32>
    %173 = vector.broadcast %171 : vector<1x4x1x256xf32> to vector<1x4x8x256xf32>
    %174 = arith.mulf %172, %173 : vector<1x4x8x256xf32>
    %175 = arith.addf %170, %174 : vector<1x4x8x256xf32>
    %176 = vector.extract_strided_slice %166 {offsets = [0, 0, 2, 0], sizes = [1, 4, 1, 256], strides = [1, 1, 1, 1]} : vector<1x4x8x256xf32> to vector<1x4x1x256xf32>
    %177 = vector.broadcast %17 : vector<1x1x8x1xf32> to vector<1x4x8x256xf32>
    %178 = vector.broadcast %176 : vector<1x4x1x256xf32> to vector<1x4x8x256xf32>
    %179 = arith.mulf %177, %178 : vector<1x4x8x256xf32>
    %180 = arith.addf %175, %179 : vector<1x4x8x256xf32>
    %181 = vector.extract_strided_slice %166 {offsets = [0, 0, 3, 0], sizes = [1, 4, 1, 256], strides = [1, 1, 1, 1]} : vector<1x4x8x256xf32> to vector<1x4x1x256xf32>
    %182 = vector.broadcast %19 : vector<1x1x8x1xf32> to vector<1x4x8x256xf32>
    %183 = vector.broadcast %181 : vector<1x4x1x256xf32> to vector<1x4x8x256xf32>
    %184 = arith.mulf %182, %183 : vector<1x4x8x256xf32>
    %185 = arith.addf %180, %184 : vector<1x4x8x256xf32>
    %186 = vector.extract_strided_slice %166 {offsets = [0, 0, 4, 0], sizes = [1, 4, 1, 256], strides = [1, 1, 1, 1]} : vector<1x4x8x256xf32> to vector<1x4x1x256xf32>
    %187 = vector.broadcast %21 : vector<1x1x8x1xf32> to vector<1x4x8x256xf32>
    %188 = vector.broadcast %186 : vector<1x4x1x256xf32> to vector<1x4x8x256xf32>
    %189 = arith.mulf %187, %188 : vector<1x4x8x256xf32>
    %190 = vector.extract_strided_slice %166 {offsets = [0, 0, 5, 0], sizes = [1, 4, 1, 256], strides = [1, 1, 1, 1]} : vector<1x4x8x256xf32> to vector<1x4x1x256xf32>
    %191 = vector.broadcast %23 : vector<1x1x8x1xf32> to vector<1x4x8x256xf32>
    %192 = vector.broadcast %190 : vector<1x4x1x256xf32> to vector<1x4x8x256xf32>
    %193 = arith.mulf %191, %192 : vector<1x4x8x256xf32>
    %194 = arith.addf %189, %193 : vector<1x4x8x256xf32>
    %195 = vector.extract_strided_slice %166 {offsets = [0, 0, 6, 0], sizes = [1, 4, 1, 256], strides = [1, 1, 1, 1]} : vector<1x4x8x256xf32> to vector<1x4x1x256xf32>
    %196 = vector.broadcast %25 : vector<1x1x8x1xf32> to vector<1x4x8x256xf32>
    %197 = vector.broadcast %195 : vector<1x4x1x256xf32> to vector<1x4x8x256xf32>
    %198 = arith.mulf %196, %197 : vector<1x4x8x256xf32>
    %199 = arith.addf %194, %198 : vector<1x4x8x256xf32>
    %200 = vector.extract_strided_slice %166 {offsets = [0, 0, 7, 0], sizes = [1, 4, 1, 256], strides = [1, 1, 1, 1]} : vector<1x4x8x256xf32> to vector<1x4x1x256xf32>
    %201 = vector.broadcast %27 : vector<1x1x8x1xf32> to vector<1x4x8x256xf32>
    %202 = vector.broadcast %200 : vector<1x4x1x256xf32> to vector<1x4x8x256xf32>
    %203 = arith.mulf %201, %202 : vector<1x4x8x256xf32>
    %204 = arith.addf %199, %203 : vector<1x4x8x256xf32>
    %cst_51 = arith.constant dense<0.000000e+00> : vector<1x4x8xf32>
    %205 = vector.multi_reduction <add>, %185, %cst_51 [3] : vector<1x4x8x256xf32> to vector<1x4x8xf32>
    %206 = vector.shape_cast %205 : vector<1x4x8xf32> to vector<1x4x8x1xf32>
    %cst_52 = arith.constant 3.906250e-03 : f32
    %207 = vector.broadcast %cst_52 : f32 to vector<1x4x8x1xf32>
    %208 = arith.mulf %206, %207 : vector<1x4x8x1xf32>
    %209 = vector.broadcast %11 : vector<1x1x8x1xf32> to vector<1x4x8x1xf32>
    %210 = arith.addf %208, %209 : vector<1x4x8x1xf32>
    %cst_53 = arith.constant dense<0.000000e+00> : vector<1x4x8xf32>
    %211 = vector.multi_reduction <add>, %204, %cst_53 [3] : vector<1x4x8x256xf32> to vector<1x4x8xf32>
    %212 = vector.shape_cast %211 : vector<1x4x8xf32> to vector<1x4x8x1xf32>
    %cst_54 = arith.constant 3.906250e-03 : f32
    %213 = vector.broadcast %cst_54 : f32 to vector<1x4x8x1xf32>
    %214 = arith.mulf %212, %213 : vector<1x4x8x1xf32>
    %215 = vector.broadcast %11 : vector<1x1x8x1xf32> to vector<1x4x8x256xf32>
    %216 = arith.addf %185, %215 : vector<1x4x8x256xf32>
    %cst_55 = arith.constant dense<0xFF800000> : vector<1x4x1xf32>
    %217 = vector.multi_reduction <maximumf>, %210, %cst_55 [2] : vector<1x4x8x1xf32> to vector<1x4x1xf32>
    %218 = vector.shape_cast %217 : vector<1x4x1xf32> to vector<1x4x1x1xf32>
    %cst_56 = arith.constant dense<0xFF800000> : vector<1x4x1xf32>
    %219 = vector.multi_reduction <maximumf>, %214, %cst_56 [2] : vector<1x4x8x1xf32> to vector<1x4x1xf32>
    %220 = vector.shape_cast %219 : vector<1x4x1xf32> to vector<1x4x1x1xf32>
    %221 = arith.maximumf %218, %220 : vector<1x4x1x1xf32>
    %222 = vector.broadcast %221 : vector<1x4x1x1xf32> to vector<1x4x8x1xf32>
    %223 = arith.subf %210, %222 : vector<1x4x8x1xf32>
    %224 = math.exp %223 : vector<1x4x8x1xf32>
    %225 = vector.broadcast %221 : vector<1x4x1x1xf32> to vector<1x4x8x1xf32>
    %226 = arith.subf %214, %225 : vector<1x4x8x1xf32>
    %227 = math.exp %226 : vector<1x4x8x1xf32>
    %cst_57 = arith.constant dense<0.000000e+00> : vector<1x4x1xf32>
    %228 = vector.multi_reduction <add>, %224, %cst_57 [2] : vector<1x4x8x1xf32> to vector<1x4x1xf32>
    %229 = vector.shape_cast %228 : vector<1x4x1xf32> to vector<1x4x1x1xf32>
    %cst_58 = arith.constant dense<0.000000e+00> : vector<1x4x1xf32>
    %230 = vector.multi_reduction <add>, %227, %cst_58 [2] : vector<1x4x8x1xf32> to vector<1x4x1xf32>
    %231 = vector.shape_cast %230 : vector<1x4x1xf32> to vector<1x4x1x1xf32>
    %232 = arith.addf %229, %231 : vector<1x4x1x1xf32>
    %233 = tpu.reciprocal %232 {approx = true} : vector<1x4x1x1xf32> -> vector<1x4x1x1xf32>
    %234 = vector.broadcast %233 : vector<1x4x1x1xf32> to vector<1x4x8x1xf32>
    %235 = arith.mulf %224, %234 : vector<1x4x8x1xf32>
    %236 = vector.broadcast %235 : vector<1x4x8x1xf32> to vector<1x4x8x256xf32>
    %237 = arith.mulf %236, %216 : vector<1x4x8x256xf32>
    %238 = vector.broadcast %233 : vector<1x4x1x1xf32> to vector<1x4x8x1xf32>
    %239 = arith.mulf %227, %238 : vector<1x4x8x1xf32>
    %240 = vector.broadcast %239 : vector<1x4x8x1xf32> to vector<1x4x8x256xf32>
    %241 = arith.mulf %240, %204 : vector<1x4x8x256xf32>
    %242 = arith.addf %237, %241 : vector<1x4x8x256xf32>
    %243 = vector.extract_strided_slice %242 {offsets = [0, 0, 0, 0], sizes = [1, 1, 8, 256], strides = [1, 1, 1, 1]} : vector<1x4x8x256xf32> to vector<1x1x8x256xf32>
    %244 = vector.shape_cast %243 : vector<1x1x8x256xf32> to vector<1x8x256xf32>
    %c0_59 = arith.constant 0 : index
    %c8_60 = arith.constant 8 : index
    %c0_61 = arith.constant 0 : index
    %245 = vector.load %arg4[%c0_59, %c8_60, %c0_61] : memref<1x32x512xf32, #tpu.memory_space<vmem>>, vector<1x8x256xf32>
    tpu.vector_store %arg4[%c0_59, %c8_60, %c0_61], %244 {strides = array<i32>} : memref<1x32x512xf32, #tpu.memory_space<vmem>>, vector<1x8x256xf32>,
    %246 = vector.extract_strided_slice %242 {offsets = [0, 1, 0, 0], sizes = [1, 1, 8, 256], strides = [1, 1, 1, 1]} : vector<1x4x8x256xf32> to vector<1x1x8x256xf32>
    %247 = vector.shape_cast %246 : vector<1x1x8x256xf32> to vector<1x8x256xf32>
    %c0_62 = arith.constant 0 : index
    %c24_63 = arith.constant 24 : index
    %c0_64 = arith.constant 0 : index
    %248 = vector.load %arg4[%c0_62, %c24_63, %c0_64] : memref<1x32x512xf32, #tpu.memory_space<vmem>>, vector<1x8x256xf32>
    tpu.vector_store %arg4[%c0_62, %c24_63, %c0_64], %247 {strides = array<i32>} : memref<1x32x512xf32, #tpu.memory_space<vmem>>, vector<1x8x256xf32>,
    %249 = vector.extract_strided_slice %242 {offsets = [0, 2, 0, 0], sizes = [1, 1, 8, 256], strides = [1, 1, 1, 1]} : vector<1x4x8x256xf32> to vector<1x1x8x256xf32>
    %250 = vector.shape_cast %249 : vector<1x1x8x256xf32> to vector<1x8x256xf32>
    %c0_65 = arith.constant 0 : index
    %c8_66 = arith.constant 8 : index
    %c256_67 = arith.constant 256 : index
    %251 = vector.load %arg4[%c0_65, %c8_66, %c256_67] : memref<1x32x512xf32, #tpu.memory_space<vmem>>, vector<1x8x256xf32>
    tpu.vector_store %arg4[%c0_65, %c8_66, %c256_67], %250 {strides = array<i32>} : memref<1x32x512xf32, #tpu.memory_space<vmem>>, vector<1x8x256xf32>,
    %252 = vector.extract_strided_slice %242 {offsets = [0, 3, 0, 0], sizes = [1, 1, 8, 256], strides = [1, 1, 1, 1]} : vector<1x4x8x256xf32> to vector<1x1x8x256xf32>
    %253 = vector.shape_cast %252 : vector<1x1x8x256xf32> to vector<1x8x256xf32>
    %c0_68 = arith.constant 0 : index
    %c24_69 = arith.constant 24 : index
    %c256_70 = arith.constant 256 : index
    %254 = vector.load %arg4[%c0_68, %c24_69, %c256_70] : memref<1x32x512xf32, #tpu.memory_space<vmem>>, vector<1x8x256xf32>
    tpu.vector_store %arg4[%c0_68, %c24_69, %c256_70], %253 {strides = array<i32>} : memref<1x32x512xf32, #tpu.memory_space<vmem>>, vector<1x8x256xf32>,
    return
  }
  func.func @transform_0(%arg0: i32) -> (i32, i32, i32, i32) {
    %c0_i32 = arith.constant 0 : i32
    %c0_i32_0 = arith.constant 0 : i32
    %c0_i32_1 = arith.constant 0 : i32
    %c0_i32_2 = arith.constant 0 : i32
    return %arg0, %c0_i32, %c0_i32_0, %c0_i32_1 : i32, i32, i32, i32
  }
  func.func @transform_1(%arg0: i32) -> (i32, i32) {
    %c0_i32 = arith.constant 0 : i32
    %c0_i32_0 = arith.constant 0 : i32
    %c0_i32_1 = arith.constant 0 : i32
    return %c0_i32, %c0_i32_0 : i32, i32
  }
  func.func @transform_2(%arg0: i32) -> (i32, i32) {
    %c0_i32 = arith.constant 0 : i32
    %c0_i32_0 = arith.constant 0 : i32
    %c0_i32_1 = arith.constant 0 : i32
    return %c0_i32, %c0_i32_0 : i32, i32
  }
  func.func @transform_3(%arg0: i32) -> (i32, i32, i32) {
    %c0_i32 = arith.constant 0 : i32
    %c0_i32_0 = arith.constant 0 : i32
    %c0_i32_1 = arith.constant 0 : i32
    return %arg0, %c0_i32, %c0_i32_0 : i32, i32, i32
  }
}

</mosaic_0001>

<bundles_post_ra>
// kernel: tpu_custom_call.1
= control target key start
LH: loop header
LB: loop body
LE: loop exit
PB: predicated region body
PF: predicated region fallthrough
CT: control target
= control target key end

     0   :  { %8 = vsyncpa [#allocation3], 0  ;;  %s3472_s0 = inlined_call_operand.hbm [shape: f32[2,4,16,256], index: 0, kind: input, shape index: {}]   ;;  %s3473_s1 = inlined_call_operand.vmem [shape: f32[112,1], index: 1, kind: input, shape index: {}]   ;;  %s3474_s2 = inlined_call_operand.vmem [shape: f32[8,256], index: 2, kind: input, shape index: {}]   ;;  %s3475_s3 = inlined_call_operand.hbm [shape: f32[2,32,512], index: 3, kind: output, shape index: {}]  }
   0x1   :  { %10 = vsyncpa [#allocation3 + $0x1], 0 }
   0x2   :  { %11 = vsyncpa [#allocation4], 0 }
   0x3   :  { %13 = vsyncpa [#allocation4 + $0x1], 0  ;;  %s2183_s12 = smov 0   ;;  %s2185_s13 = smov 0  }
   0x4   :  { %s2187_s14 = smov 0   ;;  %s2189_s15 = smov 0  }
   0x5 LB: > { %s2204_s16 = sadd.s32 4294967295, %s2154_s15   ;;  %s1877_s17 = sadd.s32 4294967294, %s2154_s15   ;;  %s2154_s15 = sphi %s2189_s15, %s3642_s15   ;;  %s2150_s14 = sphi %s2187_s14, %s3641_s14   ;;  %s2146_s13 = sphi %s2185_s13, %s3640_s13   ;;  %s2142_s12 = sphi %s2183_s12, %s3639_s12  }
   0x6   : > { %s2208_s18 = sadd.s32 1, %s2154_s15   ;;  %s26_s19 = sadd.s32 1, %s2150_s14 }
   0x7   : > { %s23_s20 = ssub.s32 %s2154_s15, %s2208_s18  ;;  %p33_p0 = scmp.ne.s32.totalorder %s2150_s14, %s2146_s13 }
   0x8   : > { %p24_p1 = scmp.eq.s32.totalorder %s23_s20, 0  ;;  %p34_p2 = scmp.eq.s32.totalorder %s2154_s15, 0 }
   0x9   : > { %p39_p3 = scmp.ne.s32.totalorder %s2146_s13, %s2142_s12  ;;  %p40_p4 = scmp.eq.s32.totalorder %s2204_s16, 0 }
   0xa   : > { %s2220_s21 = scalar_select %p24_p1, %s2150_s14, %s26_s19  }
   0xb   : > { %p2222_p5 = por %p34_p2, %p33_p0  ;;  %p2226_p6 = por %p40_p4, %p39_p3 }
   0xc   : > { %p105_p7 = scmp.eq.s32.totalorder %s2204_s16, 1  ;;  %p111_p8 = scmp.eq.s32.totalorder %s1877_s17, 1 }
   0xd   : > { %s3521_s23 = scalar_select %p2226_p6, 1, 0 }
   0xe   : > { %p1917_p10 = scmp.lt.s32.totalorder %s2154_s15, 2  ;;  %p2233_p11 = por %p105_p7, %p33_p0 }
   0xf   : > { %p2237_p12 = por %p111_p8, %p39_p3  ;;  %s137_s26 = sand.u32 1, %s2150_s14  }
  0x10   : > { %s3522_s24 = scalar_select %p2233_p11, 1, 0 }
  0x11   : > { %s3523_s25 = scalar_select %p2237_p12, 1, 0 }
  0x12   : > { %s1903_s27 = sshll.u32 %s2154_s15, 11  ;;  %s1880_s28 = sshll.u32 %s137_s26, 7 }
  0x13   : > { %s2246_s4 = scalar_lea.hbm %s3472_s0, %s1903_s27  ;;  %s141_s5 = scalar_lea.vmem [#allocation2], %s1880_s28 }
  0x14   : > { %s148_s6 = sshll.u32 %s141_s5, 4  ;;  %p2250_p13 = pnand %p1917_p10, %p2222_p5  ;;  %s2254_s6 = int_to_ptr.vmem [resolvable:$true] %s148_s6 }
  0x15   : > { %s2256_s8 = scalar_lea.sflag [#allocation3], %s137_s26  ;;  %s2062_s9 = scalar_lea.hbm %s2246_s4, 2048 }
  0x16   : > { %p2063_p0 = scmp.ne.s32.totalorder %s2246_s4, %s2062_s9  ;;  %p2064_p1 = pneg %p2250_p13 }
  0x17   : > { %s2067_s17 = scalar_lea.hbm %s3472_s0, 4096  ;;  %p2068_p4 = scmp.lt.s32.totalorder %s2246_s4, %s3472_s0 }
  0x18   : > { %p2065_p2 = pnand %p2064_p1, %p2063_p0  ;;  %p2069_p5 = scmp.lt.s32.totalorder %s2067_s17, %s2062_s9 }
  0x1a   : > { %p2066_p3 = pneg %p2065_p2  ;;  %p2070_p7 = por %p2069_p5, %p2068_p4 }
  0x1c   : > { %p2071_p8 = pnand %p2070_p7, %p2066_p3 }
  0x1e   : > { %2074 = shalt.err (!%p2071_p8)
}
  0x1f   : > { %s2075_s22 = scalar_lea.vmem %s2254_s6, 2048  ;;  %s2156_s26 = smov [#allocation2]  }
  0x20   : > { %p2076_p10 = scmp.ne.s32.totalorder %s2254_s6, %s2075_s22  ;;  %s2080_s27 = sshll.u32 %s2156_s26, 4  ;;  %s2081_s27 = int_to_ptr.vmem [resolvable:$false] %s2080_s27 }
  0x21   : > { %s2082_s28 = scalar_lea.vmem %s2081_s27, 4096  ;;  %p2083_p2 = scmp.lt.s32.totalorder %s2254_s6, %s2081_s27 }
  0x22   : > { %p2078_p9 = pnand %p2076_p10, %p2064_p1  ;;  %p2084_p12 = scmp.lt.s32.totalorder %s2082_s28, %s2075_s22 }
  0x24   : > { %p2079_p0 = pneg %p2078_p9  ;;  %p2085_p11 = por %p2084_p12, %p2083_p2 }
  0x26   : > { %p2086_p6 = pnand %p2085_p11, %p2079_p0 }
  0x28   : > { %2089 = shalt.err (!%p2086_p6)
}
  0x29   : > { %s2157_s29 = smov 256   ;;  %s2158_s30 = smov 16  }
  0x2a   : > { %1912 = dma.hbm_to_vmem [thread:$0]  (!%p2250_p13), %s2246_s4, 2048, %s2254_s6, %s2256_s8, %s2157_s29, %s2157_s29, %s2158_s30  }
  0x2b   : > { %p1883_p9 = scmp.ge.s32.totalorder %s2154_s15, 1  ;;  %p156_p1 = scmp.lt.s32.totalorder %s2154_s15, 3 }
  0x2d   : > { %p157_p3 = pnand %p1883_p9, %p156_p1 }
  0x2f   : > { %160 = sbr.rel (%p157_p3) target bundleno = 810 (0x32a), region = 32 }
  0x34   : > { %s2280_s5 = sand.u32 1, %s2146_s13   ;;  %p3525_p6 = scmp.ne.s32.totalorder %s3521_s23, 0 }
  0x35   : > { %s1884_s9 = sshll.u32 %s2280_s5, 7  ;;  %s163_s10 = scalar_lea.sflag [#allocation3], %s2280_s5 }
  0x36   : > { %s2286_s11 = scalar_lea.vmem [#allocation2], %s1884_s9 }
  0x37   : > { %2133 = dma.done.wait (%p3525_p6), %s163_s10, 2048  }
  0x38   : > { %2135 = vsyncadd (%p3525_p6), %s163_s10, 4294965248  ;;  %v2159_v0 = vmov 0   ;;  %v2293_v1 = vld [vmem:[%s2286_s11] sm:$0xff]  ;;  %v2296_v2 = vld [vmem:[%s2286_s11 + $0x8] sm:$0xff]  ;;  %vm752_vm0 = vcmask 7168   ;;  %s3358_s23 = scalar_lea.vmem [#allocation5], %s1884_s9 }
  0x39   : > { %1956 = vset.pattern.permute.xlu0 %v2159_v0  ;;  %1957 = vset.pattern.permute.xlu1 %v2159_v0  ;;  %v2299_v3 = vld [vmem:[%s2286_s11 + $0x20] sm:$0xff]  ;;  %v219_v4 = vadd.f32 %v2296_v2, %v2293_v1  ;;  %v2304_v5 = vld [vmem:[%s2286_s11 + $0x28] sm:$0xff]  ;;  %v2325_v13 = vld [vmem:[%s2286_s11 + $0x10] sm:$0xff]  ;;  %s1904_s9 = sshll.u32 %s2204_s16, 11  ;;  %s1804_s4 = sshll.u32 %s3358_s23, 4  ;;  %s3427_s4 = int_to_ptr.vmem [resolvable:$true] %s1804_s4 }
  0x3a   : > { %v2307_v6 = vld [vmem:[%s2286_s11 + $0x40] sm:$0xff]  ;;  %v2310_v7 = vld [vmem:[%s2286_s11 + $0x48] sm:$0xff]  ;;  %v222_v11 = vadd.f32 %v2304_v5, %v2299_v3  ;;  %v2328_v14 = vld [vmem:[%s2286_s11 + $0x18] sm:$0xff]  ;;  %v989_v24 = vmul.f32 %v2325_v13, %v2325_v13  ;;  %s3425_s8 = scalar_lea.hbm %s3475_s3, %s1904_s9  ;;  %s1791_s16 = scalar_lea.sflag [#allocation4], %s2280_s5 }
  0x3b   : > { %v225_v8 = vadd.f32 %v2310_v7, %v2307_v6  ;;  %v2315_v9 = vld [vmem:[%s2286_s11 + $0x60] sm:$0xff]  ;;  %v2318_v10 = vld [vmem:[%s2286_s11 + $0x68] sm:$0xff]  ;;  %220 = vadd.xlane.f32.xlu0 %v219_v4  ;;  %v2331_v15 = vld [vmem:[%s2286_s11 + $0x30] sm:$0xff]  ;;  %v977_v17 = vadd.f32 %v2328_v14, %v2325_v13  ;;  %v990_v25 = vmul.f32 %v2328_v14, %v2328_v14  ;;  %s2090_s17 = scalar_lea.vmem %s3427_s4, 2048  ;;  %p3636_p12 = scmp.ne.s32.totalorder %s3522_s24, 0 }
  0x3c   : > { %v228_v12 = vadd.f32 %v2318_v10, %v2315_v9  ;;  %v2334_v16 = vld [vmem:[%s2286_s11 + $0x38] sm:$0xff]  ;;  %v2341_v19 = vld [vmem:[%s2286_s11 + $0x50] sm:$0xff]  ;;  %v991_v27 = vmul.f32 %v2331_v15, %v2331_v15  ;;  %v193_v37 = vld [vmem:[%s3473_s1 + $0x20] sm:$0xff]  ;;  %p2091_p11 = scmp.ne.s32.totalorder %s3427_s4, %s2090_s17  ;;  %s2160_s19 = smov [#allocation5]  }
  0x3d   : > { %226 = vadd.xlane.f32.xlu1 %v225_v8  ;;  %v980_v18 = vadd.f32 %v2334_v16, %v2331_v15  ;;  %v2344_v20 = vld [vmem:[%s2286_s11 + $0x58] sm:$0xff]  ;;  %v2347_v21 = vld [vmem:[%s2286_s11 + $0x70] sm:$0xff]  ;;  %v992_v28 = vmul.f32 %v2334_v16, %v2334_v16  ;;  %v997_v29 = vadd.f32 %v990_v25, %v989_v24  ;;  %v993_v30 = vmul.f32 %v2341_v19, %v2341_v19  ;;  %v197_v40 = vld [vmem:[%s3473_s1 + $0x40] sm:$0xff]  ;;  %s2094_s20 = sshll.u32 %s2160_s19, 4  ;;  %s2095_s20 = int_to_ptr.vmem [resolvable:$false] %s2094_s20 }
  0x3e   : > { %v2350_v22 = vld [vmem:[%s2286_s11 + $0x78] sm:$0xff]  ;;  %v983_v23 = vadd.f32 %v2344_v20, %v2341_v19  ;;  %v994_v31 = vmul.f32 %v2344_v20, %v2344_v20  ;;  %v995_v33 = vmul.f32 %v2347_v21, %v2347_v21  ;;  %v191_v39 = vld [vmem:[%s3473_s1 + $0x10] sm:$0xff]  ;;  %v201_v44 = vld [vmem:[%s3473_s1 + $0x60] sm:$0xff]  ;;  %p2092_p13 = pnand %p2091_p11, %p3636_p12  ;;  %s2096_s22 = scalar_lea.vmem %s2095_s20, 4096 }
  0x3f   : > { %223 = vadd.xlane.f32.xlu0 %v222_v11  ;;  %v986_v26 = vadd.f32 %v2350_v22, %v2347_v21  ;;  %v1000_v32 = vadd.f32 %v992_v28, %v991_v27  ;;  %v996_v34 = vmul.f32 %v2350_v22, %v2350_v22  ;;  %v192_v38 = vld [vmem:[%s3473_s1 + $0x18] sm:$0xff]  ;;  %v195_v41 = vld [vmem:[%s3473_s1 + $0x30] sm:$0xff]  ;;  %v189_v46 = vld [vmem:[%s3473_s1] sm:$0xff]  ;;  %p2097_p5 = scmp.lt.s32.totalorder %s3427_s4, %s2095_s20  ;;  %p2098_p7 = scmp.lt.s32.totalorder %s2096_s22, %s2090_s17 }
  0x40   : > { %v1003_v35 = vadd.f32 %v994_v31, %v993_v30  ;;  %v200_v42 = vld [vmem:[%s3473_s1 + $0x58] sm:$0xff]  ;;  %v190_v49 = vld [vmem:[%s3473_s1 + $0x8] sm:$0xff]  ;;  %p2093_p4 = pneg %p2092_p13 }
  0x41   : > { %229 = vadd.xlane.f32.xlu1 %v228_v12  ;;  %v1006_v36 = vadd.f32 %v996_v34, %v995_v33  ;;  %v196_v43 = vld [vmem:[%s3473_s1 + $0x38] sm:$0xff]  ;;  %p2099_p8 = por %p2098_p7, %p2097_p5 }
  0x43   : > { %978 = vadd.xlane.f32.xlu0 %v977_v17  ;;  %p2100_p10 = pnand %p2099_p8, %p2093_p4 }
  0x45   : > { %981 = vadd.xlane.f32.xlu1 %v980_v18 }
  0x47   : > { %984 = vadd.xlane.f32.xlu0 %v983_v23 }
  0x49   : > { %987 = vadd.xlane.f32.xlu1 %v986_v26 }
  0x4b   : > { %998 = vadd.xlane.f32.xlu0 %v997_v29 }
  0x4d   : > { %1001 = vadd.xlane.f32.xlu1 %v1000_v32 }
  0x4f   : > { %1004 = vadd.xlane.f32.xlu0 %v1003_v35 }
  0x51   : > { %1007 = vadd.xlane.f32.xlu1 %v1006_v36 }
  0x62   : > { %1064 = vperm.xlu1 %1957, %v193_v37  }
  0x65   : > { %1051 = vperm.xlu0 %1956, %v192_v38  }
  0x66   : > { %1087 = vperm.xlu1 %1957, %v191_v39  }
  0x69   : > { %395 = vperm.xlu0 %1956, %v197_v40  }
  0x6a   : > { %297 = vperm.xlu1 %1957, %v195_v41  }
  0x6d   : > { %546 = vperm.xlu0 %1956, %v200_v42  }
  0x6e   : > { %342 = vperm.xlu1 %1957, %v196_v43  }
  0x71   : > { %599 = vperm.xlu0 %1956, %v201_v44  }
  0xc4   : > { %v221_v45 = vpop.xlane.xlu0 %220 }
  0xc5   : > { %v231_v47 = vmul.f32 0.00390625, %v221_v45 }
  0xc6   : > { %v227_v48 = vpop.xlane.xlu1 %226 }
  0xc7   : > { %v233_v50 = vmul.f32 0.00390625, %v227_v48  ;;  %v235_v51 = vmul.f32 %v231_v47, %v189_v46 }
  0xc8   : > { %v224_v52 = vpop.xlane.xlu0 %223 }
  0xc9   : > { %v237_v53 = vmul.f32 %v233_v50, %v189_v46  ;;  %v239_v54 = vadd.f32 %v235_v51, %v190_v49  ;;  %v232_v55 = vmul.f32 0.00390625, %v224_v52 }
  0xca   : > { %v230_v56 = vpop.xlane.xlu1 %229 }
  0xcb   : > { %v241_v57 = vadd.f32 %v237_v53, %v190_v49  ;;  %v234_v58 = vmul.f32 0.00390625, %v230_v56  ;;  %v1886_v59 = vmul.f32 -1.442695, %v239_v54  ;;  %v236_v60 = vmul.f32 %v232_v55, %v189_v46  ;;  %v199_v55 = vld [vmem:[%s3473_s1 + $0x50] sm:$0xff] }
  0xcc   : > { %v979_v27 = vpop.xlane.xlu0 %978 }
  0xcd   : > { %v1888_v61 = vmul.f32 -1.442695, %v241_v57  ;;  %v238_v62 = vmul.f32 %v234_v58, %v189_v46  ;;  %1958 = vpow2.f32 %v1886_v59  ;;  %v240_v63 = vadd.f32 %v236_v60, %v190_v49  ;;  %v198_v59 = vld [vmem:[%s3473_s1 + $0x48] sm:$0xff] }
  0xce   : > { %v982_v23 = vpop.xlane.xlu1 %981  ;;  %v1009_v36 = vmul.f32 0.00390625, %v979_v27 }
  0xcf   : > { %v242_v0 = vadd.f32 %v238_v62, %v190_v49  ;;  %v1887_v4 = vmul.f32 -1.442695, %v240_v63  ;;  %1960 = vpow2.f32 %v1888_v61  ;;  %v1010_v31 = vmul.f32 0.00390625, %v982_v23  ;;  %v202_v61 = vld [vmem:[%s3473_s1 + $0x68] sm:$0xff] }
  0xd0   : > { %v985_v30 = vpop.xlane.xlu0 %984  ;;  %v1017_v42 = vmul.f32 %v1009_v36, %v1009_v36 }
  0xd1   : > { %v1889_v8 = vmul.f32 -1.442695, %v242_v0  ;;  %1962 = vpow2.f32 %v1887_v4  ;;  %v1018_v34 = vmul.f32 %v1010_v31, %v1010_v31  ;;  %v1011_v45 = vmul.f32 0.00390625, %v985_v30 }
  0xd2   : > { %v988_v29 = vpop.xlane.xlu1 %987  ;;  %v1027_v62 = vsub.f32 %v2331_v15, %v1010_v31  ;;  %v1028_v0 = vsub.f32 %v2334_v16, %v1010_v31 }
  0xd3   : > { %1964 = vpow2.f32 %v1889_v8  ;;  %v1012_v39 = vmul.f32 0.00390625, %v988_v29  ;;  %v1019_v52 = vmul.f32 %v1011_v45, %v1011_v45  ;;  %v1025_v8 = vsub.f32 %v2325_v13, %v1009_v36 }
  0xd4   : > { %v999_v37 = vpop.xlane.xlu0 %998  ;;  %v1029_v29 = vsub.f32 %v2341_v19, %v1011_v45 }
  0xd5   : > { %v1013_v43 = vmul.f32 0.00390625, %v999_v37  ;;  %v1020_v48 = vmul.f32 %v1012_v39, %v1012_v39  ;;  %v1031_v23 = vsub.f32 %v2347_v21, %v1012_v39 }
  0xd6   : > { %v1002_v33 = vpop.xlane.xlu1 %1001 }
  0xd7   : > { %v1014_v35 = vmul.f32 0.00390625, %v1002_v33  ;;  %v1021_v51 = vsub.f32 %v1013_v43, %v1017_v42  ;;  %v1030_v33 = vsub.f32 %v2344_v20, %v1011_v45  ;;  %v1076_v43 = vld [vmem:[%s3474_s2 + $0x8] sm:$0xff] }
  0xd8   : > { %v1005_v46 = vpop.xlane.xlu0 %1004 }
  0xd9   : > { %v1022_v40 = vsub.f32 %v1014_v35, %v1018_v34  ;;  %v1015_v53 = vmul.f32 0.00390625, %v1005_v46  ;;  %v1033_v56 = vadd.f32 1e-05, %v1021_v51 }
  0xda   : > { %v1959_v11 = vpop.eup %1958  ;;  %v1008_v44 = vpop.xlane.xlu1 %1007 }
  0xdb   : > { %v255_v12 = vadd.f32 1.0, %v1959_v11  ;;  %v1034_v47 = vadd.f32 1e-05, %v1022_v40  ;;  %v1016_v49 = vmul.f32 0.00390625, %v1008_v44  ;;  %v1023_v57 = vsub.f32 %v1015_v53, %v1019_v52 }
  0xdc   : > { %v1961_v17 = vpop.eup %1960 }
  0xdd   : > { %1966 = vrcp.f32 %v255_v12  ;;  %v257_v25 = vadd.f32 1.0, %v1961_v17  ;;  %v1024_v54 = vsub.f32 %v1016_v49, %v1020_v48  ;;  %v1035_v60 = vadd.f32 1e-05, %v1023_v57 }
  0xde   : > { %v1963_v18 = vpop.eup %1962  ;;  %v1026_v17 = vsub.f32 %v2328_v14, %v1009_v36 }
  0xdf   : > { %v256_v24 = vadd.f32 1.0, %v1963_v18  ;;  %v1036_v58 = vadd.f32 1e-05, %v1024_v54 }
  0xe0   : > { %v1965_v26 = vpop.eup %1964  ;;  %v1052_v11 = vpop.permute.xlu0 %1051 }
  0xe1   : > { %1968 = vrcp.f32 %v256_v24  ;;  %v258_v28 = vadd.f32 1.0, %v1965_v26  ;;  %v1032_v26 = vsub.f32 %v2350_v22, %v1012_v39 }
  0xe2   : > { %1970 = vrcp.f32 %v257_v25 }
  0xe3   : > { %1972 = vrcp.f32 %v258_v28  ;;  %v1065_v28 = vpop.permute.xlu1 %1064 }
  0xe4   : > { %1974 = vrsqrt.f32 %v1034_v47 }
  0xe5   : > { %1976 = vrsqrt.f32 %v1033_v56 }
  0xe6   : > { %1978 = vrsqrt.f32 %v1036_v58 }
  0xe7   : > { %1980 = vrsqrt.f32 %v1035_v60  ;;  %v1088_v48 = vpop.permute.xlu1 %1087 }
  0xea   : > { %v1967_v32 = vpop.eup %1966 }
  0xeb   : > { %269 = vperm.xlu1 %1957, %v1967_v32  }
  0xee   : > { %v1969_v38 = vpop.eup %1968 }
  0xef   : > { %274 = vperm.xlu1 %1957, %v1969_v38   ;;  %v1971_v41 = vpop.eup %1970  ;;  %v1075_v38 = vld [vmem:[%s3474_s2] sm:$0xff] }
  0xf0   : > { %v1973_v50 = vpop.eup %1972 }
  0xf1   : > { %v1975_v63 = vpop.eup %1974 }
  0xf2   : > { %v1043_v4 = vmul.f32 %v1975_v63, %v1027_v62  ;;  %v1977_v12 = vpop.eup %1976  ;;  %v1044_v18 = vmul.f32 %v1975_v63, %v1028_v0 }
  0xf3   : > { %279 = vperm.xlu1 %1957, %v1971_v41   ;;  %v1979_v25 = vpop.eup %1978  ;;  %v1041_v27 = vmul.f32 %v1977_v12, %v1025_v8  ;;  %v1042_v30 = vmul.f32 %v1977_v12, %v1026_v17 }
  0xf4   : > { %v1056_v24 = vmul.f32 %v1052_v11, %v1043_v4  ;;  %v1057_v31 = vmul.f32 %v1052_v11, %v1044_v18  ;;  %v1981_v32 = vpop.eup %1980  ;;  %v1047_v34 = vmul.f32 %v1979_v25, %v1031_v23  ;;  %v1048_v37 = vmul.f32 %v1979_v25, %v1032_v26 }
  0xf5   : > { %v1054_v36 = vmul.f32 %v1052_v11, %v1041_v27  ;;  %v1045_v40 = vmul.f32 %v1981_v32, %v1029_v29  ;;  %v1055_v41 = vmul.f32 %v1052_v11, %v1042_v30  ;;  %v1046_v42 = vmul.f32 %v1981_v32, %v1030_v33 }
  0xf6   : > { %v1069_v35 = vadd.f32 %v1065_v28, %v1056_v24  ;;  %v1070_v39 = vadd.f32 %v1065_v28, %v1057_v31  ;;  %v1060_v44 = vmul.f32 %v1052_v11, %v1047_v34  ;;  %v1061_v47 = vmul.f32 %v1052_v11, %v1048_v37 }
  0xf7   : > { %284 = vperm.xlu1 %1957, %v1973_v50   ;;  %v1067_v45 = vadd.f32 %v1065_v28, %v1054_v36  ;;  %v1058_v49 = vmul.f32 %v1052_v11, %v1045_v40  ;;  %v1068_v50 = vadd.f32 %v1065_v28, %v1055_v41  ;;  %v1059_v52 = vmul.f32 %v1052_v11, %v1046_v42 }
  0xf8   : > { %v1079_v46 = vmul.f32 %v1075_v38, %v1069_v35  ;;  %v1080_v51 = vmul.f32 %v1076_v43, %v1070_v39  ;;  %v1073_v53 = vadd.f32 %v1065_v28, %v1060_v44 }
  0xf9   : > { %v1077_v56 = vmul.f32 %v1075_v38, %v1067_v45  ;;  %v1071_v57 = vadd.f32 %v1065_v28, %v1058_v49  ;;  %v1078_v58 = vmul.f32 %v1076_v43, %v1068_v50  ;;  %v1072_v60 = vadd.f32 %v1065_v28, %v1059_v52 }
  0xfa   : > { %v1092_v54 = vadd.f32 %v1088_v48, %v1079_v46  ;;  %v300_v45 = vlaneseq }
  0xfb   : > { %501 = vperm.xlu1 %1957, %v199_v55   ;;  %v1074_v55 = vadd.f32 %v1065_v28, %v1061_v47  ;;  %v1090_v0 = vadd.f32 %v1088_v48, %v1077_v56  ;;  %v1081_v4 = vmul.f32 %v1075_v38, %v1071_v57  ;;  %v1091_v8 = vadd.f32 %v1088_v48, %v1078_v58 }
  0xfc   : > { %v1892_v62 = vmul.f32 -1.442695, %v1092_v54  ;;  %v1082_v17 = vmul.f32 %v1076_v43, %v1072_v60 }
  0xfd   : > { %v1084_v63 = vmul.f32 %v1076_v43, %v1074_v55  ;;  %v1890_v11 = vmul.f32 -1.442695, %v1090_v0  ;;  %v1094_v24 = vadd.f32 %v1088_v48, %v1081_v4  ;;  %v1891_v25 = vmul.f32 -1.442695, %v1091_v8 }
  0xfe   : > { %1982 = vpow2.f32 %v1892_v62  ;;  %v1095_v26 = vadd.f32 %v1088_v48, %v1082_v17 }
  0xff   : > { %448 = vperm.xlu1 %1957, %v198_v59   ;;  %v1093_v59 = vadd.f32 %v1088_v48, %v1080_v51  ;;  %v1097_v23 = vadd.f32 %v1088_v48, %v1084_v63  ;;  %v1894_v28 = vmul.f32 -1.442695, %v1094_v24  ;;  %v2425_v51 = vpop.permute.xlu1 %297 }
 0x100   : > { %v1895_v30 = vmul.f32 -1.442695, %v1095_v26  ;;  %3526 = vst [vmem:[#allocation8_spill] sm:$0xff] %v2425_v51 }
 0x101   : > { %v1893_v12 = vmul.f32 -1.442695, %v1093_v59  ;;  %v1897_v29 = vmul.f32 -1.442695, %v1097_v23 }
 0x103   : > { %652 = vperm.xlu1 %1957, %v202_v61   ;;  %v1083_v61 = vmul.f32 %v1075_v38, %v1073_v53  ;;  %1984 = vpow2.f32 %v1893_v12  ;;  %v2446_v62 = vpop.permute.xlu1 %342 }
 0x104   : > { %1986 = vpow2.f32 %v1890_v11  ;;  %3530 = vst [vmem:[#allocation12_spill] sm:$0xff] %v2446_v62 }
 0x105   : > { %v1096_v18 = vadd.f32 %v1088_v48, %v1083_v61  ;;  %1988 = vpow2.f32 %v1891_v25  ;;  %v301_v48 = vshrl.u32 %v300_v45, 7 }
 0x107   : > { %v1896_v27 = vmul.f32 -1.442695, %v1096_v18  ;;  %v2430_v53 = vsub.s32 0, %v301_v48  ;;  %v2432_v54 = vsub.s32 1, %v301_v48  ;;  %v2437_v58 = vsub.s32 2, %v301_v48 }
 0x108   : > { %v2448_v63 = vsub.s32 5, %v301_v48  ;;  %v2457_v12 = vsub.s32 6, %v301_v48  ;;  %v2459_v18 = vsub.s32 3, %v301_v48  ;;  %v2463_v23 = vsub.s32 4, %v301_v48 }
 0x109   : > { %1990 = vpow2.f32 %v1896_v27  ;;  %3527 = vst [vmem:[#allocation9_spill] sm:$0xff] %v2430_v53  ;;  %3528 = vst [vmem:[#allocation10_spill] sm:$0xff] %v2432_v54  ;;  %v2465_v11 = vsub.s32 7, %v301_v48 }
 0x10a   : > { %1992 = vpow2.f32 %v1897_v29  ;;  %3529 = vst [vmem:[#allocation11_spill] sm:$0xff] %v2437_v58  ;;  %3531 = vst [vmem:[#allocation13_spill] sm:$0xff] %v2457_v12 }
 0x10b   : > { %1994 = vpow2.f32 %v1894_v28  ;;  %v1983_v31 = vpop.eup %1982 }
 0x10c   : > { %1996 = vpow2.f32 %v1895_v30  ;;  %v1124_v33 = vadd.f32 1.0, %v1983_v31  ;;  %v2483_v31 = vpop.permute.xlu0 %395 }
 0x10e   : > { %1998 = vrcp.f32 %v1124_v33 }
 0x110   : > { %v1985_v32 = vpop.eup %1984 }
 0x111   : > { %v1987_v34 = vpop.eup %1986  ;;  %v1125_v35 = vadd.f32 1.0, %v1985_v32 }
 0x112   : > { %v1989_v37 = vpop.eup %1988  ;;  %v1122_v38 = vadd.f32 1.0, %v1987_v34 }
 0x113   : > { %v1123_v41 = vadd.f32 1.0, %v1989_v37  ;;  %2000 = vrcp.f32 %v1125_v35 }
 0x114   : > { %2002 = vrcp.f32 %v1122_v38 }
 0x115   : > { %2004 = vrcp.f32 %v1123_v41 }
 0x116   : > { %v1991_v36 = vpop.eup %1990 }
 0x117   : > { %v1993_v40 = vpop.eup %1992  ;;  %v1128_v43 = vadd.f32 1.0, %v1991_v36 }
 0x118   : > { %v1995_v39 = vpop.eup %1994  ;;  %v1129_v44 = vadd.f32 1.0, %v1993_v40 }
 0x119   : > { %v1997_v42 = vpop.eup %1996  ;;  %v1126_v46 = vadd.f32 1.0, %v1995_v39  ;;  %2006 = vrcp.f32 %v1128_v43 }
 0x11a   : > { %v1127_v47 = vadd.f32 1.0, %v1997_v42  ;;  %2008 = vrcp.f32 %v1129_v44 }
 0x11b   : > { %2010 = vrcp.f32 %v1126_v46  ;;  %v1999_v49 = vpop.eup %1998 }
 0x11c   : > { %2012 = vrcp.f32 %v1127_v47  ;;  %v2428_v52 = vmul.f32 %v1999_v49, %v2331_v15 }
 0x11e   : > { %v1165_v59 = vrot.slane %v2428_v52, %v2430_v53  ;;  %v1205_v60 = vrot.slane %v2428_v52, %v2432_v54 }
 0x120   : > { %v2001_v50 = vpop.eup %2000  ;;  %v1188_v25 = vmul.f32 %v1165_v59, %v2425_v51  ;;  %v1228_v26 = vmul.f32 %v1205_v60, %v2446_v62 }
 0x121   : > { %v2003_v55 = vpop.eup %2002  ;;  %v2435_v56 = vmul.f32 %v2001_v50, %v2334_v16 }
 0x122   : > { %v2005_v57 = vpop.eup %2004  ;;  %v2444_v15 = vmul.f32 %v2003_v55, %v2325_v13  ;;  %v1253_v13 = vrot.slane %v2428_v52, %v2437_v58  ;;  %v1236_v40 = vadd.f32 %v1228_v26, %v1188_v25 }
 0x123   : > { %v2451_v16 = vmul.f32 %v2005_v57, %v2328_v14  ;;  %v1169_v4 = vrot.slane %v2435_v56, %v2430_v53  ;;  %v1209_v8 = vrot.slane %v2435_v56, %v2432_v54  ;;  %v1257_v27 = vrot.slane %v2435_v56, %v2437_v58 }
 0x124   : > { %v1157_v28 = vrot.slane %v2444_v15, %v2430_v53  ;;  %v1197_v30 = vrot.slane %v2444_v15, %v2432_v54  ;;  %v1276_v36 = vmul.f32 %v1253_v13, %v2483_v31 }
 0x125   : > { %v1189_v32 = vmul.f32 %v1169_v4, %v2425_v51  ;;  %v1229_v33 = vmul.f32 %v1209_v8, %v2446_v62  ;;  %v1161_v34 = vrot.slane %v2451_v16, %v2430_v53  ;;  %v1249_v38 = vrot.slane %v2451_v16, %v2437_v58 }
 0x126   : > { %v2007_v61 = vpop.eup %2006  ;;  %v1277_v41 = vmul.f32 %v1257_v27, %v2483_v31  ;;  %v1226_v45 = vmul.f32 %v1197_v30, %v2446_v62 }
 0x127   : > { %v2009_v0 = vpop.eup %2008  ;;  %v2468_v24 = vmul.f32 %v2007_v61, %v2347_v21  ;;  %v1245_v21 = vrot.slane %v2444_v15, %v2437_v58  ;;  %v1237_v46 = vadd.f32 %v1229_v33, %v1189_v32  ;;  %v1187_v47 = vmul.f32 %v1161_v34, %v2425_v51  ;;  %v2541_v33 = vpop.permute.xlu0 %546 }
 0x128   : > { %v2011_v17 = vpop.eup %2010  ;;  %v2475_v29 = vmul.f32 %v2009_v0, %v2350_v22  ;;  %v1201_v22 = vrot.slane %v2451_v16, %v2432_v54  ;;  %v1275_v4 = vmul.f32 %v1249_v38, %v2483_v31  ;;  %3532 = vst [vmem:[#allocation14_spill] sm:$0xff] %v2541_v33  ;;  %v2543_v34 = vadd.f32 %v1276_v36, %v1236_v40 }
 0x129   : > { %v2013_v14 = vpop.eup %2012  ;;  %v2492_v35 = vmul.f32 %v2011_v17, %v2341_v19  ;;  %v1181_v39 = vrot.slane %v2468_v24, %v2430_v53  ;;  %v1221_v42 = vrot.slane %v2468_v24, %v2432_v54  ;;  %v1274_v59 = vmul.f32 %v1245_v21, %v2483_v31 }
 0x12a   : > { %v2495_v37 = vmul.f32 %v2013_v14, %v2344_v20  ;;  %v1186_v20 = vmul.f32 %v1157_v28, %v2425_v51  ;;  %v1185_v43 = vrot.slane %v2475_v29, %v2430_v53  ;;  %v1225_v44 = vrot.slane %v2475_v29, %v2432_v54 }
 0x12b   : > { %v1227_v48 = vmul.f32 %v1201_v22, %v2446_v62  ;;  %v1173_v49 = vrot.slane %v2492_v35, %v2430_v53  ;;  %v1213_v55 = vrot.slane %v2492_v35, %v2432_v54  ;;  %v1192_v60 = vmul.f32 %v1181_v39, %v2425_v51 }
 0x12c   : > { %v1177_v50 = vrot.slane %v2495_v37, %v2430_v53  ;;  %v1217_v57 = vrot.slane %v2495_v37, %v2432_v54  ;;  %v1232_v61 = vmul.f32 %v1221_v42, %v2446_v62  ;;  %v1269_v0 = vrot.slane %v2468_v24, %v2437_v58 }
 0x12d   : > { %v1193_v8 = vmul.f32 %v1185_v43, %v2425_v51  ;;  %v1233_v17 = vmul.f32 %v1225_v44, %v2446_v62  ;;  %v1273_v13 = vrot.slane %v2475_v29, %v2437_v58  ;;  %v1234_v14 = vadd.f32 %v1226_v45, %v1186_v20 }
 0x12e   : > { %v1235_v25 = vadd.f32 %v1227_v48, %v1187_v47  ;;  %v1261_v26 = vrot.slane %v2492_v35, %v2437_v58  ;;  %v1265_v27 = vrot.slane %v2495_v37, %v2437_v58  ;;  %v1190_v28 = vmul.f32 %v1173_v49, %v2425_v51 }
 0x12f   : > { %v1191_v30 = vmul.f32 %v1177_v50, %v2425_v51  ;;  %v1230_v21 = vmul.f32 %v1213_v55, %v2446_v62  ;;  %v1231_v32 = vmul.f32 %v1217_v57, %v2446_v62  ;;  %v1240_v38 = vadd.f32 %v1232_v61, %v1192_v60 }
 0x130   : > { %v1280_v39 = vmul.f32 %v1269_v0, %v2483_v31  ;;  %v2548_v42 = vadd.f32 %v1277_v41, %v1237_v46  ;;  %v1241_v43 = vadd.f32 %v1233_v17, %v1193_v8  ;;  %v1281_v44 = vmul.f32 %v1273_v13, %v2483_v31  ;;  %v2579_v8 = vpop.permute.xlu0 %599 }
 0x131   : > { %v2553_v47 = vadd.f32 %v1274_v59, %v1234_v14  ;;  %v2555_v45 = vadd.f32 %v1275_v4, %v1235_v25  ;;  %v1278_v40 = vmul.f32 %v1261_v26, %v2483_v31  ;;  %v1238_v48 = vadd.f32 %v1230_v21, %v1190_v28  ;;  %3533 = vst [vmem:[#allocation15_spill] sm:$0xff] %v2579_v8 }
 0x132   : > { %v1239_v49 = vadd.f32 %v1231_v32, %v1191_v30  ;;  %v1279_v41 = vmul.f32 %v1265_v27, %v2483_v31  ;;  %v1389_v46 = vrot.slane %v2428_v52, %v2448_v63  ;;  %v2563_v50 = vadd.f32 %v1280_v39, %v1240_v38 }
 0x133   : > { %v1393_v59 = vrot.slane %v2435_v56, %v2448_v63  ;;  %v2571_v60 = vadd.f32 %v1281_v44, %v1241_v43  ;;  %v1437_v0 = vrot.slane %v2428_v52, %v2457_v12  ;;  %v1441_v4 = vrot.slane %v2435_v56, %v2457_v12 }
 0x134   : > { %v2589_v26 = vadd.f32 %v1278_v40, %v1238_v48  ;;  %v2591_v27 = vadd.f32 %v1279_v41, %v1239_v49  ;;  %v2594_v28 = vmul.f32 %v1389_v46, %v2541_v33  ;;  %v1381_v32 = vrot.slane %v2444_v15, %v2448_v63 }
 0x135   : > { %v2599_v21 = vmul.f32 %v1393_v59, %v2541_v33  ;;  %v1385_v38 = vrot.slane %v2451_v16, %v2448_v63  ;;  %v1429_v39 = vrot.slane %v2444_v15, %v2457_v12  ;;  %v2608_v43 = vmul.f32 %v1437_v0, %v2579_v8 }
 0x136   : > { %v2611_v44 = vmul.f32 %v1441_v4, %v2579_v8  ;;  %v1433_v48 = vrot.slane %v2451_v16, %v2457_v12  ;;  %v1397_v0 = vrot.slane %v2492_v35, %v2448_v63  ;;  %v1401_v4 = vrot.slane %v2495_v37, %v2448_v63 }
 0x137   : > { %v1445_v30 = vrot.slane %v2492_v35, %v2457_v12  ;;  %v1449_v25 = vrot.slane %v2495_v37, %v2457_v12  ;;  %v2634_v41 = vmul.f32 %v1381_v32, %v2541_v33  ;;  %v2637_v46 = vmul.f32 %v1385_v38, %v2541_v33 }
 0x138   : > { %v2640_v59 = vmul.f32 %v1429_v39, %v2579_v8  ;;  %v2645_v61 = vmul.f32 %v1433_v48, %v2579_v8  ;;  %v1405_v57 = vrot.slane %v2468_v24, %v2448_v63  ;;  %v1409_v55 = vrot.slane %v2475_v29, %v2448_v63 }
 0x139   : > { %v1453_v32 = vrot.slane %v2468_v24, %v2457_v12  ;;  %v2662_v20 = vmul.f32 %v1397_v0, %v2541_v33  ;;  %v2665_v22 = vmul.f32 %v1401_v4, %v2541_v33  ;;  %v2668_v19 = vmul.f32 %v1445_v30, %v2579_v8 }
 0x13a   : > { %v2671_v38 = vmul.f32 %v1449_v25, %v2579_v8  ;;  %v2684_v4 = vmul.f32 %v1405_v57, %v2541_v33  ;;  %v2687_v30 = vmul.f32 %v1409_v55, %v2541_v33 }
 0x13b   : > { %3534 = vst [vmem:[#allocation16_spill] sm:$0xff] %v2662_v20  ;;  %3535 = vst [vmem:[#allocation17_spill] sm:$0xff] %v2665_v22  ;;  %v2690_v25 = vmul.f32 %v1453_v32, %v2579_v8 }
 0x13c   : > { %3536 = vst [vmem:[#allocation18_spill] sm:$0xff] %v2668_v19  ;;  %3537 = vst [vmem:[#allocation19_spill] sm:$0xff] %v2671_v38 }
 0x13d   : > { %3538 = vst [vmem:[#allocation20_spill] sm:$0xff] %v2684_v4  ;;  %3539 = vst [vmem:[#allocation21_spill] sm:$0xff] %v2687_v30 }
 0x13e   : > { %3540 = vst [vmem:[#allocation22_spill] sm:$0xff] %v2690_v25 }
 0x166   : > { %v270_v36 = vpop.permute.xlu1 %269 }
 0x167   : > { %v2674_v39 = vmul.f32 %v270_v36, %v2293_v1  ;;  %v2677_v17 = vmul.f32 %v270_v36, %v2296_v2 }
 0x169   : > { %v303_v2 = vrot.slane %v2674_v39, %v2430_v53  ;;  %v307_v36 = vrot.slane %v2677_v17, %v2430_v53  ;;  %v348_v0 = vrot.slane %v2674_v39, %v2432_v54  ;;  %v352_v57 = vrot.slane %v2677_v17, %v2432_v54 }
 0x16a   : > { %v275_v55 = vpop.permute.xlu1 %274  ;;  %v401_v32 = vrot.slane %v2674_v39, %v2437_v58  ;;  %v405_v48 = vrot.slane %v2677_v17, %v2437_v58 }
 0x16b   : > { %v2711_v40 = vmul.f32 %v275_v55, %v2299_v3  ;;  %v2714_v14 = vmul.f32 %v275_v55, %v2304_v5  ;;  %v332_v13 = vmul.f32 %v303_v2, %v2425_v51  ;;  %v333_v25 = vmul.f32 %v307_v36, %v2425_v51 }
 0x16c   : > { %v377_v30 = vmul.f32 %v348_v0, %v2446_v62  ;;  %v378_v4 = vmul.f32 %v352_v57, %v2446_v62  ;;  %v430_v38 = vmul.f32 %v401_v32, %v2483_v31  ;;  %v431_v1 = vmul.f32 %v405_v48, %v2483_v31 }
 0x16d   : > { %v311_v49 = vrot.slane %v2711_v40, %v2430_v53  ;;  %v315_v3 = vrot.slane %v2714_v14, %v2430_v53  ;;  %v356_v5 = vrot.slane %v2711_v40, %v2432_v54  ;;  %v360_v2 = vrot.slane %v2714_v14, %v2432_v54 }
 0x16e   : > { %v280_v36 = vpop.permute.xlu1 %279  ;;  %v385_v0 = vadd.f32 %v377_v30, %v332_v13  ;;  %v386_v55 = vadd.f32 %v378_v4, %v333_v25  ;;  %v409_v57 = vrot.slane %v2711_v40, %v2437_v58  ;;  %v413_v48 = vrot.slane %v2714_v14, %v2437_v58 }
 0x16f   : > { %v2735_v32 = vmul.f32 %v280_v36, %v2307_v6  ;;  %v2738_v19 = vmul.f32 %v280_v36, %v2310_v7  ;;  %v334_v22 = vmul.f32 %v311_v49, %v2425_v51  ;;  %v335_v20 = vmul.f32 %v315_v3, %v2425_v51 }
 0x170   : > { %v2742_v8 = vadd.f32 %v430_v38, %v385_v0  ;;  %v2744_v13 = vadd.f32 %v431_v1, %v386_v55  ;;  %v379_v4 = vmul.f32 %v356_v5, %v2446_v62  ;;  %v380_v30 = vmul.f32 %v360_v2, %v2446_v62 }
 0x171   : > { %3541 = vst [vmem:[#allocation23_spill] sm:$0xff] %v2735_v32  ;;  %v432_v25 = vmul.f32 %v409_v57, %v2483_v31  ;;  %v433_v6 = vmul.f32 %v413_v48, %v2483_v31  ;;  %v319_v1 = vrot.slane %v2735_v32, %v2430_v53  ;;  %v323_v5 = vrot.slane %v2738_v19, %v2430_v53 }
 0x172   : > { %v285_v36 = vpop.permute.xlu1 %284  ;;  %v387_v3 = vadd.f32 %v379_v4, %v334_v22  ;;  %v388_v38 = vadd.f32 %v380_v30, %v335_v20  ;;  %v364_v55 = vrot.slane %v2735_v32, %v2432_v54  ;;  %v368_v57 = vrot.slane %v2738_v19, %v2432_v54 }
 0x173   : > { %v2759_v2 = vmul.f32 %v285_v36, %v2315_v9  ;;  %v2762_v0 = vmul.f32 %v285_v36, %v2318_v10  ;;  %v336_v48 = vmul.f32 %v319_v1, %v2425_v51  ;;  %v337_v4 = vmul.f32 %v323_v5, %v2425_v51 }
 0x174   : > { %v2768_v22 = vadd.f32 %v432_v25, %v387_v3  ;;  %v2770_v20 = vadd.f32 %v433_v6, %v388_v38  ;;  %v381_v9 = vmul.f32 %v364_v55, %v2446_v62  ;;  %v382_v30 = vmul.f32 %v368_v57, %v2446_v62 }
 0x175   : > { %3542 = vst [vmem:[#allocation24_spill] sm:$0xff] %v2759_v2  ;;  %3543 = vst [vmem:[#allocation25_spill] sm:$0xff] %v2762_v0  ;;  %v417_v10 = vrot.slane %v2735_v32, %v2437_v58  ;;  %v421_v36 = vrot.slane %v2738_v19, %v2437_v58  ;;  %v470_v25 = vrot.slane %v2735_v32, %v2459_v18 }
 0x176   : > { %v2780_v49 = vpop.permute.xlu1 %501  ;;  %v507_v3 = vrot.slane %v2674_v39, %v2463_v23  ;;  %v511_v38 = vrot.slane %v2677_v17, %v2463_v23  ;;  %v3544_v1 = vrot.slane %v2428_v52, %v2463_v23  ;;  %v3545_v55 = vrot.slane %v2435_v56, %v2463_v23 }
 0x177   : > { %v3546_v6 = vrot.slane %v2444_v15, %v2463_v23  ;;  %v3547_v32 = vrot.slane %v2451_v16, %v2463_v23  ;;  %v389_v51 = vadd.f32 %v381_v9, %v336_v48  ;;  %v390_v58 = vadd.f32 %v382_v30, %v337_v4 }
 0x178   : > { %v1372_v5 = vmul.f32 %v3544_v1, %v2780_v49  ;;  %v1373_v57 = vmul.f32 %v3545_v55, %v2780_v49  ;;  %v434_v54 = vmul.f32 %v417_v10, %v2483_v31  ;;  %v435_v1 = vmul.f32 %v421_v36, %v2483_v31 }
 0x179   : > { %v1370_v7 = vmul.f32 %v3546_v6, %v2780_v49  ;;  %v1371_v62 = vmul.f32 %v3547_v32, %v2780_v49  ;;  %v2815_v32 = vmul.f32 %v507_v3, %v2780_v49  ;;  %v2818_v48 = vmul.f32 %v511_v38, %v2780_v49 }
 0x17a   : > { %v1420_v0 = vadd.f32 %v2594_v28, %v1372_v5  ;;  %v1421_v55 = vadd.f32 %v2599_v21, %v1373_v57  ;;  %v2812_v6 = vpop.permute.xlu1 %448  ;;  %v442_v33 = vadd.f32 %v434_v54, %v389_v51  ;;  %v443_v12 = vadd.f32 %v435_v1, %v390_v58 }
 0x17b   : > { %v1418_v2 = vadd.f32 %v2634_v41, %v1370_v7  ;;  %v1419_v53 = vadd.f32 %v2637_v46, %v1371_v62  ;;  %v3548_v28 = vrot.slane %v2428_v52, %v2459_v18  ;;  %v3549_v21 = vrot.slane %v2435_v56, %v2459_v18 }
 0x17c   : > { %v3550_v51 = vrot.slane %v2444_v15, %v2459_v18  ;;  %v3551_v58 = vrot.slane %v2451_v16, %v2459_v18  ;;  %v3552_v46 = vrot.slane %v2468_v24, %v2459_v18  ;;  %v3553_v9 = vrot.slane %v2475_v29, %v2459_v18 }
 0x17d   : > { %v1324_v4 = vmul.f32 %v3548_v28, %v2812_v6  ;;  %v1325_v62 = vmul.f32 %v3549_v21, %v2812_v6  ;;  %v3554_v10 = vrot.slane %v2492_v35, %v2459_v18  ;;  %v3555_v3 = vrot.slane %v2495_v37, %v2459_v18 }
 0x17e   : > { %v1322_v54 = vmul.f32 %v3550_v51, %v2812_v6  ;;  %v1323_v41 = vmul.f32 %v3551_v58, %v2812_v6  ;;  %v1328_v7 = vmul.f32 %v3552_v46, %v2812_v6  ;;  %v1329_v30 = vmul.f32 %v3553_v9, %v2812_v6  ;;  %v2864_v21 = vpop.permute.xlu1 %652 }
 0x17f   : > { %v1326_v36 = vmul.f32 %v3554_v10, %v2812_v6  ;;  %v1327_v38 = vmul.f32 %v3555_v3, %v2812_v6  ;;  %v2853_v5 = vadd.f32 %v1324_v4, %v2543_v34  ;;  %v2856_v57 = vadd.f32 %v1325_v62, %v2548_v42 }
 0x180   : > { %v2859_v1 = vadd.f32 %v1322_v54, %v2553_v47  ;;  %v2862_v28 = vadd.f32 %v1323_v41, %v2555_v45  ;;  %v2867_v51 = vadd.f32 %v1328_v7, %v2563_v50  ;;  %v2870_v58 = vadd.f32 %v1329_v30, %v2571_v60 }
 0x181   : > { %v2873_v34 = vadd.f32 %v1326_v36, %v2589_v26  ;;  %v2876_v42 = vadd.f32 %v1327_v38, %v2591_v27  ;;  %v1525_v47 = vadd.f32 %v2856_v57, %v2853_v5  ;;  %v1468_v4 = vadd.f32 %v2608_v43, %v1420_v0 }
 0x182   : > { %3556 = vst [vmem:[#allocation26_spill] sm:$0xff] %v2867_v51  ;;  %3557 = vst [vmem:[#allocation27_spill] sm:$0xff] %v2870_v58  ;;  %v1522_v45 = vadd.f32 %v2862_v28, %v2859_v1  ;;  %v1469_v50 = vadd.f32 %v2611_v44, %v1421_v55  ;;  %v1531_v60 = vadd.f32 %v2870_v58, %v2867_v51 }
 0x183   : > { %3558 = vst [vmem:[#allocation28_spill] sm:$0xff] %v2873_v34  ;;  %3559 = vst [vmem:[#allocation29_spill] sm:$0xff] %v2876_v42  ;;  %v1528_v26 = vadd.f32 %v2876_v42, %v2873_v34  ;;  %v3560_v27 = vrot.slane %v2428_v52, %v2465_v11  ;;  %v3561_v54 = vrot.slane %v2435_v56, %v2465_v11  ;;  %1526 = vadd.xlane.f32.xlu0 %v1525_v47 }
 0x184   : > { %1523 = vadd.xlane.f32.xlu1 %v1522_v45  ;;  %v1466_v43 = vadd.f32 %v2640_v59, %v1418_v2  ;;  %v1467_v44 = vadd.f32 %v2645_v61, %v1419_v53  ;;  %v3562_v0 = vrot.slane %v2444_v15, %v2465_v11  ;;  %v3563_v56 = vrot.slane %v2451_v16, %v2465_v11 }
 0x185   : > { %v1508_v62 = vmul.f32 %v3560_v27, %v2864_v21  ;;  %v1509_v41 = vmul.f32 %v3561_v54, %v2864_v21  ;;  %v3564_v59 = vrot.slane %v2674_v39, %v2459_v18  ;;  %v3565_v15 = vrot.slane %v2677_v17, %v2459_v18 }
 0x186   : > { %v1506_v55 = vmul.f32 %v3562_v0, %v2864_v21  ;;  %v1507_v7 = vmul.f32 %v3563_v56, %v2864_v21  ;;  %v3566_v9 = vrot.slane %v2711_v40, %v2459_v18  ;;  %v3567_v16 = vrot.slane %v2714_v14, %v2459_v18  ;;  %v3575_v56 = vld [vmem:[#allocation15_spill] sm:$0xff] }
 0x187   : > { %v2902_v46 = vadd.f32 %v1508_v62, %v1468_v4  ;;  %v2904_v52 = vadd.f32 %v1509_v41, %v1469_v50  ;;  %v483_v2 = vmul.f32 %v3564_v59, %v2812_v6  ;;  %v484_v61 = vmul.f32 %v3565_v15, %v2812_v6  ;;  %1532 = vadd.xlane.f32.xlu0 %v1531_v60 }
 0x188   : > { %v2914_v53 = vadd.f32 %v1506_v55, %v1466_v43  ;;  %v485_v30 = vmul.f32 %v3566_v9, %v2812_v6  ;;  %v486_v10 = vmul.f32 %v3567_v16, %v2812_v6  ;;  %v2930_v3 = vadd.f32 %v1507_v7, %v1467_v44  ;;  %1529 = vadd.xlane.f32.xlu1 %v1528_v26  ;;  %v3572_v26 = vld [vmem:[#allocation13_spill] sm:$0xff]  ;;  %v3574_v43 = vld [vmem:[#allocation14_spill] sm:$0xff]  ;;  %v3577_v16 = vld [vmem:[#allocation24_spill] sm:$0xff] }
 0x189   : > { %v1545_v36 = vadd.f32 %v2904_v52, %v2902_v46  ;;  %v2933_v38 = vadd.f32 %v483_v2, %v2742_v8  ;;  %v487_v47 = vmul.f32 %v470_v25, %v2812_v6  ;;  %v2937_v45 = vadd.f32 %v484_v61, %v2744_v13 }
 0x18a   : > { %v2940_v4 = vadd.f32 %v485_v30, %v2768_v22  ;;  %v2943_v50 = vadd.f32 %v486_v10, %v2770_v20  ;;  %v1542_v27 = vadd.f32 %v2930_v3, %v2914_v53  ;;  %v3570_v8 = vrot.slane %v2738_v19, %v2459_v18  ;;  %v3576_v30 = vld [vmem:[#allocation9_spill] sm:$0xff] }
 0x18b   : > { %v2951_v25 = vadd.f32 %v487_v47, %v442_v33  ;;  %v552_v13 = vrot.slane %v2674_v39, %v2448_v63  ;;  %v703_v22 = vadd.f32 %v2937_v45, %v2933_v38  ;;  %v556_v60 = vrot.slane %v2677_v17, %v2448_v63  ;;  %1546 = vadd.xlane.f32.xlu0 %v1545_v36  ;;  %v3578_v36 = vld [vmem:[#allocation25_spill] sm:$0xff] }
 0x18c   : > { %3568 = vst [vmem:[#allocation30_spill] sm:$0xff] %v2940_v4  ;;  %3569 = vst [vmem:[#allocation31_spill] sm:$0xff] %v2943_v50  ;;  %v488_v62 = vmul.f32 %v3570_v8, %v2812_v6  ;;  %v706_v20 = vadd.f32 %v2943_v50, %v2940_v4  ;;  %v605_v54 = vrot.slane %v2674_v39, %v3572_v26  ;;  %1543 = vadd.xlane.f32.xlu1 %v1542_v27  ;;  %v3579_v27 = vld [vmem:[#allocation10_spill] sm:$0xff] }
 0x18d   : > { %3571 = vst [vmem:[#allocation32_spill] sm:$0xff] %v2951_v25  ;;  %v581_v33 = vmul.f32 %v552_v13, %v3574_v43  ;;  %v609_v44 = vrot.slane %v2677_v17, %v3572_v26  ;;  %v658_v0 = vrot.slane %v2674_v39, %v2465_v11  ;;  %v582_v55 = vmul.f32 %v556_v60, %v3574_v43  ;;  %v3581_v60 = vld [vmem:[#allocation8_spill] sm:$0xff] }
 0x18e   : > { %v2963_v41 = vadd.f32 %v488_v62, %v443_v12  ;;  %v634_v7 = vmul.f32 %v605_v54, %v3575_v56  ;;  %v662_v59 = vrot.slane %v2677_v17, %v2465_v11  ;;  %v327_v10 = vrot.slane %v3577_v16, %v3576_v30  ;;  %v3580_v62 = vld [vmem:[#allocation11_spill] sm:$0xff] }
 0x18f   : > { %v589_v2 = vadd.f32 %v581_v33, %v2815_v32  ;;  %v635_v15 = vmul.f32 %v609_v44, %v3575_v56  ;;  %v687_v61 = vmul.f32 %v658_v0, %v2864_v21  ;;  %v590_v39 = vadd.f32 %v582_v55, %v2818_v48  ;;  %704 = vadd.xlane.f32.xlu0 %v703_v22  ;;  %v3583_v0 = vld [vmem:[#allocation12_spill] sm:$0xff] }
 0x190   : > { %3573 = vst [vmem:[#allocation13_spill] sm:$0xff] %v2963_v41  ;;  %v709_v12 = vadd.f32 %v2963_v41, %v2951_v25  ;;  %v688_v9 = vmul.f32 %v662_v59, %v2864_v21  ;;  %v331_v47 = vrot.slane %v3578_v36, %v3576_v30  ;;  %v372_v8 = vrot.slane %v3577_v16, %v3579_v27 }
 0x191   : > { %v642_v17 = vadd.f32 %v634_v7, %v589_v2  ;;  %v376_v32 = vrot.slane %v3578_v36, %v3579_v27  ;;  %v425_v13 = vrot.slane %v3577_v16, %v3580_v62  ;;  %707 = vadd.xlane.f32.xlu1 %v706_v20  ;;  %v643_v48 = vadd.f32 %v635_v15, %v590_v39 }
 0x192   : > { %v338_v54 = vmul.f32 %v327_v10, %v3581_v60  ;;  %v339_v33 = vmul.f32 %v331_v47, %v3581_v60  ;;  %v383_v55 = vmul.f32 %v372_v8, %v3583_v0  ;;  %v429_v59 = vrot.slane %v3578_v36, %v3580_v62  ;;  %v3585_v10 = vld [vmem:[#allocation23_spill] sm:$0xff] }
 0x193   : > { %v2993_v44 = vadd.f32 %v687_v61, %v642_v17  ;;  %v384_v7 = vmul.f32 %v376_v32, %v3583_v0  ;;  %v2999_v2 = vadd.f32 %v688_v9, %v643_v48  ;;  %v436_v30 = vmul.f32 %v425_v13, %v2483_v31  ;;  %710 = vadd.xlane.f32.xlu0 %v709_v12 }
 0x194   : > { %v478_v22 = vrot.slane %v3577_v16, %v2459_v18  ;;  %v482_v20 = vrot.slane %v3578_v36, %v2459_v18  ;;  %v391_v15 = vadd.f32 %v383_v55, %v338_v54  ;;  %v437_v39 = vmul.f32 %v429_v59, %v2483_v31 }
 0x195   : > { %3582 = vst [vmem:[#allocation14_spill] sm:$0xff] %v2993_v44  ;;  %3584 = vst [vmem:[#allocation15_spill] sm:$0xff] %v2999_v2  ;;  %v392_v61 = vadd.f32 %v384_v7, %v339_v33  ;;  %v523_v47 = vrot.slane %v3585_v10, %v2463_v23  ;;  %v723_v9 = vadd.f32 %v2999_v2, %v2993_v44 }
 0x196   : > { %v489_v17 = vmul.f32 %v478_v22, %v2812_v6  ;;  %v490_v27 = vmul.f32 %v482_v20, %v2812_v6  ;;  %v527_v8 = vrot.slane %v2738_v19, %v2463_v23  ;;  %v444_v32 = vadd.f32 %v436_v30, %v391_v15 }
 0x197   : > { %v445_v18 = vadd.f32 %v437_v39, %v392_v61  ;;  %v540_v62 = vmul.f32 %v523_v47, %v2780_v49  ;;  %v568_v31 = vrot.slane %v3585_v10, %v2448_v63  ;;  %724 = vadd.xlane.f32.xlu1 %v723_v9  ;;  %v572_v13 = vrot.slane %v2738_v19, %v2448_v63 }
 0x198   : > { %v541_v12 = vmul.f32 %v527_v8, %v2780_v49  ;;  %v621_v48 = vrot.slane %v3585_v10, %v3572_v26  ;;  %v625_v6 = vrot.slane %v2738_v19, %v3572_v26  ;;  %v3025_v60 = vadd.f32 %v489_v17, %v444_v32 }
 0x199   : > { %v3027_v54 = vadd.f32 %v490_v27, %v445_v18  ;;  %v585_v33 = vmul.f32 %v568_v31, %v3574_v43  ;;  %v674_v0 = vrot.slane %v3585_v10, %v2465_v11  ;;  %v586_v55 = vmul.f32 %v572_v13, %v3574_v43 }
 0x19a   : > { %3586 = vst [vmem:[#allocation9_spill] sm:$0xff] %v3025_v60  ;;  %v638_v7 = vmul.f32 %v621_v48, %v3575_v56  ;;  %v639_v59 = vmul.f32 %v625_v6, %v3575_v56  ;;  %v678_v30 = vrot.slane %v2738_v19, %v2465_v11  ;;  %v515_v61 = vrot.slane %v2711_v40, %v2463_v23 }
 0x19b   : > { %3587 = vst [vmem:[#allocation24_spill] sm:$0xff] %v3027_v54  ;;  %v712_v22 = vadd.f32 %v3027_v54, %v3025_v60  ;;  %v593_v20 = vadd.f32 %v585_v33, %v540_v62  ;;  %v691_v15 = vmul.f32 %v674_v0, %v2864_v21  ;;  %v594_v39 = vadd.f32 %v586_v55, %v541_v12 }
 0x19c   : > { %v692_v10 = vmul.f32 %v678_v30, %v2864_v21  ;;  %v519_v47 = vrot.slane %v2714_v14, %v2463_v23  ;;  %v560_v9 = vrot.slane %v2711_v40, %v2448_v63  ;;  %v538_v17 = vmul.f32 %v515_v61, %v2780_v49 }
 0x19d   : > { %713 = vadd.xlane.f32.xlu0 %v712_v22  ;;  %v646_v19 = vadd.f32 %v638_v7, %v593_v20  ;;  %v564_v27 = vrot.slane %v2714_v14, %v2448_v63  ;;  %v613_v8 = vrot.slane %v2711_v40, %v3572_v26  ;;  %v647_v32 = vadd.f32 %v639_v59, %v594_v39 }
 0x19e   : > { %v539_v18 = vmul.f32 %v519_v47, %v2780_v49  ;;  %v583_v62 = vmul.f32 %v560_v9, %v3574_v43  ;;  %v617_v31 = vrot.slane %v2714_v14, %v3572_v26  ;;  %v666_v6 = vrot.slane %v2711_v40, %v2465_v11 }
 0x19f   : > { %v3056_v12 = vadd.f32 %v691_v15, %v646_v19  ;;  %v584_v13 = vmul.f32 %v564_v27, %v3574_v43  ;;  %v636_v48 = vmul.f32 %v613_v8, %v3575_v56  ;;  %v3062_v33 = vadd.f32 %v692_v10, %v647_v32  ;;  %v3593_v19 = vld [vmem:[#allocation16_spill] sm:$0xff]  ;;  %v3594_v27 = vld [vmem:[#allocation17_spill] sm:$0xff] }
 0x1a0   : > { %v591_v0 = vadd.f32 %v583_v62, %v538_v17  ;;  %v637_v55 = vmul.f32 %v617_v31, %v3575_v56  ;;  %v670_v7 = vrot.slane %v2714_v14, %v2465_v11  ;;  %v689_v30 = vmul.f32 %v666_v6, %v2864_v21  ;;  %v3598_v6 = vld [vmem:[#allocation18_spill] sm:$0xff] }
 0x1a1   : > { %3588 = vst [vmem:[#allocation25_spill] sm:$0xff] %v3056_v12  ;;  %3589 = vst [vmem:[#allocation10_spill] sm:$0xff] %v3062_v33  ;;  %v592_v59 = vadd.f32 %v584_v13, %v539_v18  ;;  %v3590_v22 = vrot.slane %v2492_v35, %v2463_v23  ;;  %v3591_v40 = vrot.slane %v2495_v37, %v2463_v23 }
 0x1a2   : > { %v729_v61 = vadd.f32 %v3062_v33, %v3056_v12  ;;  %v644_v39 = vadd.f32 %v636_v48, %v591_v0  ;;  %v690_v10 = vmul.f32 %v670_v7, %v2864_v21  ;;  %v3592_v14 = vrot.slane %v2492_v35, %v2465_v11 }
 0x1a3   : > { %v1374_v20 = vmul.f32 %v3590_v22, %v2780_v49  ;;  %v1375_v15 = vmul.f32 %v3591_v40, %v2780_v49  ;;  %v645_v9 = vadd.f32 %v637_v55, %v592_v59  ;;  %v3595_v32 = vrot.slane %v2495_v37, %v2465_v11  ;;  %v3599_v55 = vld [vmem:[#allocation19_spill] sm:$0xff] }
 0x1a4   : > { %v1510_v47 = vmul.f32 %v3592_v14, %v2864_v21  ;;  %730 = vadd.xlane.f32.xlu1 %v729_v61  ;;  %v3089_v62 = vadd.f32 %v689_v30, %v644_v39  ;;  %v531_v31 = vrot.slane %v3577_v16, %v2463_v23  ;;  %v535_v35 = vrot.slane %v3578_v36, %v2463_v23 }
 0x1a5   : > { %v1422_v17 = vadd.f32 %v3593_v19, %v1374_v20  ;;  %v1423_v8 = vadd.f32 %v3594_v27, %v1375_v15  ;;  %v1511_v18 = vmul.f32 %v3595_v32, %v2864_v21  ;;  %v576_v13 = vrot.slane %v3577_v16, %v2448_v63 }
 0x1a6   : > { %3596 = vst [vmem:[#allocation11_spill] sm:$0xff] %v3089_v62  ;;  %v3097_v48 = vadd.f32 %v690_v10, %v645_v9  ;;  %v580_v37 = vrot.slane %v3578_v36, %v2448_v63  ;;  %v542_v59 = vmul.f32 %v531_v31, %v2780_v49  ;;  %v543_v30 = vmul.f32 %v535_v35, %v2780_v49 }
 0x1a7   : > { %v1470_v0 = vadd.f32 %v3598_v6, %v1422_v17  ;;  %v1471_v7 = vadd.f32 %v3599_v55, %v1423_v8  ;;  %v587_v22 = vmul.f32 %v576_v13, %v3574_v43  ;;  %v629_v20 = vrot.slane %v3577_v16, %v3572_v26  ;;  %v3604_v13 = vld [vmem:[#allocation20_spill] sm:$0xff] }
 0x1a8   : > { %3597 = vst [vmem:[#allocation8_spill] sm:$0xff] %v3097_v48  ;;  %v726_v40 = vadd.f32 %v3097_v48, %v3089_v62  ;;  %v588_v39 = vmul.f32 %v580_v37, %v3574_v43  ;;  %v633_v63 = vrot.slane %v3578_v36, %v3572_v26  ;;  %v682_v9 = vrot.slane %v3577_v16, %v2465_v11 }
 0x1a9   : > { %v3110_v15 = vadd.f32 %v1510_v47, %v1470_v0  ;;  %v3112_v61 = vadd.f32 %v1511_v18, %v1471_v7  ;;  %v595_v10 = vadd.f32 %v587_v22, %v542_v59  ;;  %v640_v14 = vmul.f32 %v629_v20, %v3575_v56 }
 0x1aa   : > { %727 = vadd.xlane.f32.xlu0 %v726_v40  ;;  %v596_v17 = vadd.f32 %v588_v39, %v543_v30  ;;  %v686_v47 = vrot.slane %v3578_v36, %v2465_v11  ;;  %v3602_v43 = vrot.slane %v2468_v24, %v2463_v23  ;;  %v641_v8 = vmul.f32 %v633_v63, %v3575_v56  ;;  %v3611_v40 = vld [vmem:[#allocation22_spill] sm:$0xff] }
 0x1ab   : > { %3600 = vst [vmem:[#allocation12_spill] sm:$0xff] %v3110_v15  ;;  %3601 = vst [vmem:[#allocation23_spill] sm:$0xff] %v3112_v61  ;;  %v1548_v19 = vadd.f32 %v3112_v61, %v3110_v15  ;;  %v648_v32 = vadd.f32 %v640_v14, %v595_v10  ;;  %v693_v18 = vmul.f32 %v682_v9, %v2864_v21 }
 0x1ac   : > { %v1376_v27 = vmul.f32 %v3602_v43, %v2780_v49  ;;  %v3603_v16 = vrot.slane %v2475_v29, %v2463_v23  ;;  %v694_v35 = vmul.f32 %v686_v47, %v2864_v21  ;;  %v3605_v6 = vrot.slane %v2475_v29, %v3572_v26  ;;  %v3608_v23 = vld [vmem:[#allocation21_spill] sm:$0xff] }
 0x1ad   : > { %1549 = vadd.xlane.f32.xlu1 %v1548_v19  ;;  %v3606_v55 = vrot.slane %v2468_v24, %v2465_v11  ;;  %v649_v37 = vadd.f32 %v641_v8, %v596_v17  ;;  %v3144_v59 = vadd.f32 %v693_v18, %v648_v32  ;;  %v3609_v30 = vrot.slane %v2475_v29, %v2465_v11  ;;  %v3165_v11 = vld [vmem:[%s3473_s1 + $0x28] sm:$0xff] }
 0x1ae   : > { %v1377_v31 = vmul.f32 %v3603_v16, %v2780_v49  ;;  %v1424_v36 = vadd.f32 %v3604_v13, %v1376_v27  ;;  %v1465_v0 = vmul.f32 %v3605_v6, %v3575_v56 }
 0x1af   : > { %v1512_v7 = vmul.f32 %v3606_v55, %v2864_v21  ;;  %3607 = vst [vmem:[#allocation16_spill] sm:$0xff] %v3144_v59  ;;  %v1513_v22 = vmul.f32 %v3609_v30, %v2864_v21  ;;  %v3151_v20 = vadd.f32 %v694_v35, %v649_v37 }
 0x1b0   : > { %v1425_v49 = vadd.f32 %v3608_v23, %v1377_v31  ;;  %v1472_v26 = vadd.f32 %v3611_v40, %v1424_v36 }
 0x1b1   : > { %3610 = vst [vmem:[#allocation17_spill] sm:$0xff] %v3151_v20  ;;  %v732_v39 = vadd.f32 %v3151_v20, %v3144_v59 }
 0x1b2   : > { %v1473_v56 = vadd.f32 %v1465_v0, %v1425_v49  ;;  %v3156_v24 = vadd.f32 %v1512_v7, %v1472_v26 }
 0x1b3   : > { %733 = vadd.xlane.f32.xlu0 %v732_v39 }
 0x1b4   : > { %3612 = vst [vmem:[#allocation18_spill] sm:$0xff] %v3156_v24  ;;  %v3158_v10 = vadd.f32 %v1513_v22, %v1473_v56 }
 0x1b6   : > { %3613 = vst [vmem:[#allocation19_spill] sm:$0xff] %v3158_v10  ;;  %v1551_v63 = vadd.f32 %v3158_v10, %v3156_v24 }
 0x1b8   : > { %1552 = vadd.xlane.f32.xlu0 %v1551_v63 }
 0x1be   : > { %741 = vperm.xlu1 %1957, %v3165_v11  }
 0x20c   : > { %v1527_v29 = vpop.xlane.xlu0 %1526 }
 0x20d   : > { %v1524_v21 = vpop.xlane.xlu1 %1523  ;;  %v1535_v14 = vmul.f32 0.00390625, %v1527_v29 }
 0x20e   : > { %v1534_v9 = vmul.f32 0.00390625, %v1524_v21 }
 0x20f   : > { %v3169_v19 = vadd.f32 %v1535_v14, %v3165_v11 }
 0x210   : > { %v3172_v17 = vadd.f32 %v1534_v9, %v3165_v11  ;;  %v1533_v47 = vpop.xlane.xlu0 %1532 }
 0x211   : > { %v1530_v43 = vpop.xlane.xlu1 %1529  ;;  %v1573_v27 = vsel %vm752_vm0, %v3169_v19, -inf  ;;  %v1537_v21 = vmul.f32 0.00390625, %v1533_v47 }
 0x212   : > { %v1566_v8 = vsel %vm752_vm0, %v3172_v17, -inf  ;;  %v1574_v32 = vrot.slane %v1573_v27, 4  ;;  %v1536_v35 = vmul.f32 0.00390625, %v1530_v43 }
 0x213   : > { %v1567_v18 = vrot.slane %v1566_v8, 4  ;;  %v3200_v47 = vadd.f32 %v1537_v21, %v3165_v11 }
 0x214   : > { %v1575_v16 = vmax.f32 %v1573_v27, %v1574_v32  ;;  %v1547_v13 = vpop.xlane.xlu0 %1546  ;;  %v3185_v22 = vadd.f32 %v1536_v35, %v3165_v11 }
 0x215   : > { %v1568_v31 = vmax.f32 %v1566_v8, %v1567_v18  ;;  %v1544_v36 = vpop.xlane.xlu1 %1543  ;;  %v3178_v6 = vmul.f32 0.00390625, %v1547_v13  ;;  %v1587_v24 = vsel %vm752_vm0, %v3200_v47, -inf }
 0x216   : > { %v3180_v0 = vmul.f32 0.00390625, %v1544_v36  ;;  %v1576_v55 = vrot.slane %v1575_v16, 2 }
 0x217   : > { %v1569_v7 = vrot.slane %v1568_v31, 2  ;;  %v1600_v37 = vrot.slane %v3178_v6, 4 }
 0x218   : > { %v1594_v23 = vrot.slane %v3180_v0, 4  ;;  %v1577_v49 = vmax.f32 %v1575_v16, %v1576_v55  ;;  %v705_v40 = vpop.xlane.xlu0 %704  ;;  %v1580_v16 = vsel %vm752_vm0, %v3185_v22, -inf }
 0x219   : > { %v1570_v30 = vmax.f32 %v1568_v31, %v1569_v7  ;;  %v1601_v56 = vmax.f32 %v3178_v6, %v1600_v37  ;;  %v715_v63 = vmul.f32 0.00390625, %v705_v40 }
 0x21a   : > { %v708_v26 = vpop.xlane.xlu1 %707  ;;  %v1595_v39 = vmax.f32 %v3180_v0, %v1594_v23  ;;  %v1578_v8 = vrot.slane %v1577_v49, 1 }
 0x21b   : > { %v716_v29 = vmul.f32 0.00390625, %v708_v26  ;;  %v1602_v14 = vrot.slane %v1601_v56, 2  ;;  %v3190_v43 = vadd.f32 %v715_v63, %v3165_v11  ;;  %v1571_v32 = vrot.slane %v1570_v30, 1 }
 0x21c   : > { %v1596_v9 = vrot.slane %v1595_v39, 2  ;;  %v711_v18 = vpop.xlane.xlu0 %710  ;;  %v1581_v63 = vrot.slane %v1580_v16, 4 }
 0x21d   : > { %v3193_v27 = vadd.f32 %v716_v29, %v3165_v11  ;;  %v1603_v31 = vmax.f32 %v1601_v56, %v1602_v14  ;;  %v753_v13 = vsel %vm752_vm0, %v3190_v43, -inf  ;;  %v717_v40 = vmul.f32 0.00390625, %v711_v18 }
 0x21e   : > { %v1597_v35 = vmax.f32 %v1595_v39, %v1596_v9  ;;  %v754_v36 = vrot.slane %v753_v13, 4  ;;  %v1579_v29 = vmax.f32 %v1577_v49, %v1578_v8  ;;  %v1572_v56 = vmax.f32 %v1570_v30, %v1571_v32 }
 0x21f   : > { %v760_v55 = vsel %vm752_vm0, %v3193_v27, -inf  ;;  %v1604_v37 = vrot.slane %v1603_v31, 1  ;;  %v3207_v10 = vadd.f32 %v717_v40, %v3165_v11  ;;  %v1582_v8 = vmax.f32 %v1580_v16, %v1581_v63 }
 0x220   : > { %v725_v7 = vpop.xlane.xlu1 %724  ;;  %v1598_v23 = vrot.slane %v1597_v35, 1  ;;  %v755_v39 = vmax.f32 %v753_v13, %v754_v36  ;;  %v761_v51 = vrot.slane %v760_v55, 4 }
 0x221   : > { %v3204_v26 = vmul.f32 0.00390625, %v725_v7  ;;  %v1605_v14 = vmax.f32 %v1603_v31, %v1604_v37  ;;  %v767_v7 = vsel %vm752_vm0, %v3207_v10, -inf  ;;  %v1583_v16 = vrot.slane %v1582_v8, 2 }
 0x222   : > { %v1599_v9 = vmax.f32 %v1597_v35, %v1598_v23  ;;  %v756_v58 = vrot.slane %v755_v39, 2  ;;  %v768_v31 = vrot.slane %v767_v7, 4  ;;  %v762_v59 = vmax.f32 %v760_v55, %v761_v51 }
 0x223   : > { %v781_v21 = vrot.slane %v3204_v26, 4  ;;  %v1619_v20 = vmax.f32 %v1579_v29, %v1605_v14 }
 0x224   : > { %v1618_v18 = vmax.f32 %v1572_v56, %v1599_v9  ;;  %v757_v32 = vmax.f32 %v755_v39, %v756_v58  ;;  %v769_v29 = vmax.f32 %v767_v7, %v768_v31  ;;  %v1588_v58 = vrot.slane %v1587_v24, 4 }
 0x225   : > { %v782_v49 = vmax.f32 %v3204_v26, %v781_v21  ;;  %v1623_v13 = vsub.f32 %v3169_v19, %v1619_v20  ;;  %v1635_v36 = vsub.f32 %v3178_v6, %v1619_v20 }
 0x226   : > { %v714_v30 = vpop.xlane.xlu0 %713  ;;  %v1622_v37 = vsub.f32 %v3172_v17, %v1618_v18  ;;  %v1634_v23 = vsub.f32 %v3180_v0, %v1618_v18  ;;  %v758_v40 = vrot.slane %v757_v32, 1  ;;  %v770_v20 = vrot.slane %v769_v29, 2 }
 0x227   : > { %v718_v35 = vmul.f32 0.00390625, %v714_v30  ;;  %v783_v56 = vrot.slane %v782_v49, 2  ;;  %v1628_v14 = vmul.f32 1.442695, %v1623_v13  ;;  %v1640_v9 = vmul.f32 1.442695, %v1635_v36 }
 0x228   : > { %v1638_v63 = vmul.f32 1.442695, %v1634_v23  ;;  %v1626_v19 = vmul.f32 1.442695, %v1622_v37  ;;  %v759_v6 = vmax.f32 %v757_v32, %v758_v40  ;;  %v763_v30 = vrot.slane %v762_v59, 2 }
 0x229   : > { %v3220_v21 = vadd.f32 %v718_v35, %v3165_v11  ;;  %v784_v39 = vmax.f32 %v782_v49, %v783_v56  ;;  %2014 = vpow2.f32 %v1628_v14  ;;  %v771_v55 = vmax.f32 %v769_v29, %v770_v20 }
 0x22a   : > { %2016 = vpow2.f32 %v1640_v9  ;;  %v1589_v35 = vmax.f32 %v1587_v24, %v1588_v58  ;;  %v1584_v13 = vmax.f32 %v1582_v8, %v1583_v16  ;;  %v764_v37 = vmax.f32 %v762_v59, %v763_v30 }
 0x22b   : > { %v774_v17 = vsel %vm752_vm0, %v3220_v21, -inf  ;;  %v785_v0 = vrot.slane %v784_v39, 1  ;;  %2018 = vpow2.f32 %v1638_v63  ;;  %v772_v56 = vrot.slane %v771_v55, 1 }
 0x22c   : > { %v775_v18 = vrot.slane %v774_v17, 4  ;;  %2020 = vpow2.f32 %v1626_v19  ;;  %v1590_v63 = vrot.slane %v1589_v35, 2  ;;  %v765_v20 = vrot.slane %v764_v37, 1 }
 0x22d   : > { %v731_v7 = vpop.xlane.xlu1 %730  ;;  %v786_v11 = vmax.f32 %v784_v39, %v785_v0  ;;  %v1585_v39 = vrot.slane %v1584_v13, 1 }
 0x22e   : > { %v3224_v51 = vmul.f32 0.00390625, %v731_v7  ;;  %v776_v31 = vmax.f32 %v774_v17, %v775_v18  ;;  %v773_v17 = vmax.f32 %v771_v55, %v772_v56  ;;  %v3241_v30 = vmax.f32 %v1589_v35, %v1590_v63 }
 0x22f   : > { %v805_v36 = vmax.f32 %v759_v6, %v786_v11 }
 0x230   : > { %v793_v49 = vrot.slane %v3224_v51, 4  ;;  %v777_v14 = vrot.slane %v776_v31, 2 }
 0x231   : > { %v809_v29 = vsub.f32 %v3190_v43, %v805_v36  ;;  %v821_v59 = vsub.f32 %v3204_v26, %v805_v36 }
 0x232   : > { %v794_v23 = vmax.f32 %v3224_v51, %v793_v49  ;;  %v3236_v16 = vmax.f32 %v776_v31, %v777_v14  ;;  %v1586_v49 = vmax.f32 %v1584_v13, %v1585_v39 }
 0x233   : > { %v728_v32 = vpop.xlane.xlu0 %727  ;;  %v813_v43 = vmul.f32 1.442695, %v809_v29  ;;  %v825_v14 = vmul.f32 1.442695, %v821_v59 }
 0x234   : > { %v3228_v40 = vmul.f32 0.00390625, %v728_v32  ;;  %v795_v9 = vrot.slane %v794_v23, 2  ;;  %v766_v32 = vmax.f32 %v764_v37, %v765_v20  ;;  %v779_v13 = vrot.slane %v3236_v16, 1 }
 0x235   : > { %2022 = vpow2.f32 %v813_v43 }
 0x236   : > { %v1550_v7 = vpop.xlane.xlu1 %1549  ;;  %v787_v19 = vrot.slane %v3228_v40, 4  ;;  %v796_v24 = vmax.f32 %v794_v23, %v795_v9  ;;  %v3239_v18 = vpop.eup %2014 }
 0x237   : > { %v3232_v8 = vmul.f32 0.00390625, %v1550_v7  ;;  %v3243_v23 = vpop.eup %2016  ;;  %v1653_v26 = vsel %vm752_vm0, %v3239_v18, 0.0 }
 0x238   : > { %v788_v58 = vmax.f32 %v3228_v40, %v787_v19  ;;  %v797_v6 = vrot.slane %v796_v24, 1  ;;  %v1654_v55 = vrot.slane %v1653_v26, 4  ;;  %v1681_v56 = vsel %vm752_vm0, %v3243_v23, 0.0  ;;  %v3250_v7 = vpop.eup %2018 }
 0x239   : > { %v1606_v0 = vrot.slane %v3232_v8, 4  ;;  %v1682_v63 = vrot.slane %v1681_v56, 4  ;;  %v3253_v19 = vpop.eup %2020  ;;  %v1674_v37 = vsel %vm752_vm0, %v3250_v7, 0.0 }
 0x23a   : > { %v789_v11 = vrot.slane %v788_v58, 2  ;;  %v798_v36 = vmax.f32 %v796_v24, %v797_v6  ;;  %v1675_v59 = vrot.slane %v1674_v37, 4  ;;  %v1655_v60 = vadd.f32 %v1654_v55, %v1653_v26 }
 0x23b   : > { %v1607_v31 = vmax.f32 %v3232_v8, %v1606_v0  ;;  %v1683_v6 = vadd.f32 %v1682_v63, %v1681_v56  ;;  %v1646_v62 = vsel %vm752_vm0, %v3253_v19, 0.0 }
 0x23c   : > { %v790_v9 = vmax.f32 %v788_v58, %v789_v11  ;;  %v734_v35 = vpop.xlane.xlu0 %733  ;;  %v807_v39 = vmax.f32 %v773_v17, %v798_v36 }
 0x23d   : > { %v1608_v29 = vrot.slane %v1607_v31, 2  ;;  %v3257_v24 = vmul.f32 0.00390625, %v734_v35  ;;  %v1684_v48 = vrot.slane %v1683_v6, 2 }
 0x23e   : > { %v791_v20 = vrot.slane %v790_v9, 1  ;;  %v811_v58 = vsub.f32 %v3207_v10, %v807_v39  ;;  %v823_v0 = vsub.f32 %v3224_v51, %v807_v39  ;;  %v1676_v10 = vadd.f32 %v1675_v59, %v1674_v37 }
 0x23f   : > { %v1609_v54 = vmax.f32 %v1607_v31, %v1608_v29  ;;  %v799_v17 = vrot.slane %v3257_v24, 4  ;;  %v1656_v51 = vrot.slane %v1655_v60, 2  ;;  %v1685_v31 = vadd.f32 %v1684_v48, %v1683_v6 }
 0x240   : > { %v792_v11 = vmax.f32 %v790_v9, %v791_v20  ;;  %v817_v43 = vmul.f32 1.442695, %v811_v58  ;;  %v829_v50 = vmul.f32 1.442695, %v823_v0  ;;  %v1592_v37 = vrot.slane %v3241_v30, 1 }
 0x241   : > { %v1553_v36 = vpop.xlane.xlu0 %1552  ;;  %v1610_v4 = vrot.slane %v1609_v54, 1  ;;  %v800_v56 = vmax.f32 %v3257_v24, %v799_v17  ;;  %v1647_v59 = vrot.slane %v1646_v62, 4  ;;  %v1677_v48 = vrot.slane %v1676_v10, 2 }
 0x242   : > { %v806_v35 = vmax.f32 %v766_v32, %v792_v11  ;;  %v3265_v63 = vmul.f32 0.00390625, %v1553_v36  ;;  %2024 = vpow2.f32 %v817_v43  ;;  %v1657_v32 = vadd.f32 %v1656_v51, %v1655_v60  ;;  %v3275_v43 = vpop.eup %2022 }
 0x243   : > { %2026 = vpow2.f32 %v829_v50  ;;  %v1611_v55 = vmax.f32 %v1609_v54, %v1610_v4  ;;  %v801_v39 = vrot.slane %v800_v56, 2  ;;  %v1686_v11 = vrot.slane %v1685_v31, 1 }
 0x244   : > { %v810_v9 = vsub.f32 %v3193_v27, %v806_v35  ;;  %v822_v26 = vsub.f32 %v3228_v40, %v806_v35  ;;  %2028 = vpow2.f32 %v825_v14  ;;  %v1612_v29 = vrot.slane %v3265_v63, 4 }
 0x245   : > { %v1620_v0 = vmax.f32 %v1586_v49, %v1611_v55  ;;  %v802_v17 = vmax.f32 %v800_v56, %v801_v39  ;;  %v1658_v60 = vrot.slane %v1657_v32, 1  ;;  %v780_v49 = vmax.f32 %v3236_v16, %v779_v13 }
 0x246   : > { %v815_v20 = vmul.f32 1.442695, %v810_v9  ;;  %v827_v58 = vmul.f32 1.442695, %v822_v26  ;;  %v1613_v50 = vmax.f32 %v3265_v63, %v1612_v29  ;;  %v1687_v36 = vadd.f32 %v1686_v11, %v1685_v31 }
 0x247   : > { %v1624_v27 = vsub.f32 %v3185_v22, %v1620_v0  ;;  %v1636_v4 = vsub.f32 %v3232_v8, %v1620_v0  ;;  %v803_v54 = vrot.slane %v802_v17, 1  ;;  %v1659_v51 = vadd.f32 %v1658_v60, %v1657_v32 }
 0x248   : > { %2030 = vpow2.f32 %v815_v20  ;;  %v1614_v40 = vrot.slane %v1613_v50, 2  ;;  %v1648_v9 = vadd.f32 %v1647_v59, %v1646_v62  ;;  %v1678_v26 = vadd.f32 %v1677_v48, %v1676_v10 }
 0x249   : > { %2032 = vpow2.f32 %v827_v58  ;;  %v1630_v14 = vmul.f32 1.442695, %v1624_v27  ;;  %v1642_v6 = vmul.f32 1.442695, %v1636_v4  ;;  %v804_v35 = vmax.f32 %v802_v17, %v803_v54 }
 0x24a   : > { %v1615_v56 = vmax.f32 %v1613_v50, %v1614_v40  ;;  %v1703_v55 = vadd.f32 %v1687_v36, %v1659_v51  ;;  %v1593_v39 = vmax.f32 %v3241_v30, %v1592_v37  ;;  %v1649_v29 = vrot.slane %v1648_v9, 2 }
 0x24b   : > { %2034 = vpow2.f32 %v1630_v14  ;;  %v808_v22 = vmax.f32 %v780_v49, %v804_v35  ;;  %v1679_v20 = vrot.slane %v1678_v26, 1 }
 0x24c   : > { %2036 = vpow2.f32 %v1642_v6  ;;  %v1616_v8 = vrot.slane %v1615_v56, 1  ;;  %v1650_v32 = vadd.f32 %v1649_v29, %v1648_v9  ;;  %v833_v6 = vsel %vm752_vm0, %v3275_v43, 0.0 }
 0x24d   : > { %v812_v58 = vsub.f32 %v3220_v21, %v808_v22  ;;  %v824_v16 = vsub.f32 %v3257_v24, %v808_v22  ;;  %2038 = vrcp.f32 %v1703_v55  ;;  %v1680_v17 = vadd.f32 %v1679_v20, %v1678_v26 }
 0x24e   : > { %v1617_v13 = vmax.f32 %v1615_v56, %v1616_v8  ;;  %v1651_v37 = vrot.slane %v1650_v32, 1  ;;  %v834_v26 = vrot.slane %v833_v6, 4 }
 0x24f   : > { %v3280_v31 = vpop.eup %2024  ;;  %v819_v10 = vmul.f32 1.442695, %v812_v58  ;;  %v831_v0 = vmul.f32 1.442695, %v824_v16 }
 0x250   : > { %v3282_v62 = vpop.eup %2026  ;;  %v1621_v11 = vmax.f32 %v1593_v39, %v1617_v13  ;;  %v847_v30 = vsel %vm752_vm0, %v3280_v31, 0.0  ;;  %v1652_v48 = vadd.f32 %v1651_v37, %v1650_v32 }
 0x251   : > { %v3284_v59 = vpop.eup %2028  ;;  %v875_v21 = vsel %vm752_vm0, %v3282_v62, 0.0  ;;  %2040 = vpow2.f32 %v819_v10  ;;  %v848_v54 = vrot.slane %v847_v30, 4 }
 0x252   : > { %v1625_v24 = vsub.f32 %v3200_v47, %v1621_v11  ;;  %v1637_v50 = vsub.f32 %v3265_v63, %v1621_v11  ;;  %2042 = vpow2.f32 %v831_v0  ;;  %v861_v4 = vsel %vm752_vm0, %v3284_v59, 0.0 }
 0x253   : > { %v876_v49 = vrot.slane %v875_v21, 4  ;;  %v1702_v63 = vadd.f32 %v1680_v17, %v1652_v48  ;;  %v862_v56 = vrot.slane %v861_v4, 4  ;;  %v849_v8 = vadd.f32 %v848_v54, %v847_v30 }
 0x254   : > { %v1632_v40 = vmul.f32 1.442695, %v1625_v24  ;;  %v1644_v60 = vmul.f32 1.442695, %v1637_v50 }
 0x255   : > { %v3292_v27 = vpop.eup %2030  ;;  %v877_v39 = vadd.f32 %v876_v49, %v875_v21  ;;  %v863_v32 = vadd.f32 %v862_v56, %v861_v4  ;;  %v850_v17 = vrot.slane %v849_v8, 2  ;;  %v835_v21 = vadd.f32 %v834_v26, %v833_v6 }
 0x256   : > { %v3296_v14 = vpop.eup %2032  ;;  %v840_v47 = vsel %vm752_vm0, %v3292_v27, 0.0  ;;  %2044 = vpow2.f32 %v1632_v40 }
 0x257   : > { %v841_v36 = vrot.slane %v840_v47, 4  ;;  %v868_v35 = vsel %vm752_vm0, %v3296_v14, 0.0  ;;  %2046 = vpow2.f32 %v1644_v60  ;;  %v878_v24 = vrot.slane %v877_v39, 2 }
 0x258   : > { %v869_v51 = vrot.slane %v868_v35, 4  ;;  %v3304_v9 = vpop.eup %2034  ;;  %2048 = vrcp.f32 %v1702_v63  ;;  %v864_v40 = vrot.slane %v863_v32, 2 }
 0x259   : > { %v842_v22 = vadd.f32 %v841_v36, %v840_v47  ;;  %v3306_v55 = vpop.eup %2036  ;;  %v1660_v20 = vsel %vm752_vm0, %v3304_v9, 0.0 }
 0x25a   : > { %v870_v29 = vadd.f32 %v869_v51, %v868_v35  ;;  %v1661_v58 = vrot.slane %v1660_v20, 4  ;;  %v1688_v16 = vsel %vm752_vm0, %v3306_v55, 0.0  ;;  %v3312_v13 = vpop.eup %2038  ;;  %v836_v35 = vrot.slane %v835_v21, 2 }
 0x25b   : > { %v1689_v0 = vrot.slane %v1688_v16, 4  ;;  %v843_v11 = vrot.slane %v842_v22, 2  ;;  %v1711_v30 = vmul.f32 %v3312_v13, %v3239_v18  ;;  %v851_v18 = vadd.f32 %v850_v17, %v849_v8 }
 0x25c   : > { %v871_v10 = vrot.slane %v870_v29, 2  ;;  %v1662_v37 = vadd.f32 %v1661_v58, %v1660_v20  ;;  %v879_v51 = vadd.f32 %v878_v24, %v877_v39  ;;  %v837_v17 = vadd.f32 %v836_v35, %v835_v21 }
 0x25d   : > { %v1690_v50 = vadd.f32 %v1689_v0, %v1688_v16  ;;  %1721 = vperm.xlu0 %1956, %v1711_v30   ;;  %v844_v49 = vadd.f32 %v843_v11, %v842_v22  ;;  %v865_v0 = vadd.f32 %v864_v40, %v863_v32 }
 0x25e   : > { %v1663_v48 = vrot.slane %v1662_v37, 2  ;;  %v3316_v54 = vpop.eup %2040  ;;  %v872_v47 = vadd.f32 %v871_v10, %v870_v29  ;;  %v838_v25 = vrot.slane %v837_v17, 1 }
 0x25f   : > { %v1691_v60 = vrot.slane %v1690_v50, 2  ;;  %v3318_v4 = vpop.eup %2042  ;;  %v854_v63 = vsel %vm752_vm0, %v3316_v54, 0.0  ;;  %v845_v29 = vrot.slane %v844_v49, 1 }
 0x260   : > { %v1664_v36 = vadd.f32 %v1663_v48, %v1662_v37  ;;  %v882_v6 = vsel %vm752_vm0, %v3318_v4, 0.0  ;;  %v855_v26 = vrot.slane %v854_v63, 4  ;;  %v873_v10 = vrot.slane %v872_v47, 1 }
 0x261   : > { %v1692_v56 = vadd.f32 %v1691_v60, %v1690_v50  ;;  %v883_v20 = vrot.slane %v882_v6, 4  ;;  %v852_v37 = vrot.slane %v851_v18, 1  ;;  %v880_v60 = vrot.slane %v879_v51, 1 }
 0x262   : > { %v1665_v58 = vrot.slane %v1664_v36, 1  ;;  %v856_v32 = vadd.f32 %v855_v26, %v854_v63  ;;  %v846_v33 = vadd.f32 %v845_v29, %v844_v49  ;;  %v874_v12 = vadd.f32 %v873_v10, %v872_v47 }
 0x263   : > { %v3324_v16 = vpop.eup %2044  ;;  %v1693_v22 = vrot.slane %v1692_v56, 1  ;;  %v884_v61 = vadd.f32 %v883_v20, %v882_v6  ;;  %v853_v6 = vadd.f32 %v852_v37, %v851_v18  ;;  %v881_v20 = vadd.f32 %v880_v60, %v879_v51 }
 0x264   : > { %v3326_v11 = vpop.eup %2046  ;;  %v1667_v8 = vsel %vm752_vm0, %v3324_v16, 0.0  ;;  %v1666_v30 = vadd.f32 %v1665_v58, %v1664_v36  ;;  %v866_v36 = vrot.slane %v865_v0, 1  ;;  %v857_v2 = vrot.slane %v856_v32, 2 }
 0x265   : > { %v2049_v48 = vpop.eup %2048  ;;  %v1668_v50 = vrot.slane %v1667_v8, 4  ;;  %v1695_v39 = vsel %vm752_vm0, %v3326_v11, 0.0  ;;  %v1694_v24 = vadd.f32 %v1693_v22, %v1692_v56  ;;  %v885_v35 = vrot.slane %v884_v61, 2 }
 0x266   : > { %v1696_v15 = vrot.slane %v1695_v39, 4  ;;  %v1710_v42 = vmul.f32 %v2049_v48, %v3253_v19  ;;  %v890_v22 = vadd.f32 %v874_v12, %v846_v33  ;;  %v839_v26 = vadd.f32 %v838_v25, %v837_v17 }
 0x267   : > { %v1704_v40 = vadd.f32 %v1694_v24, %v1666_v30  ;;  %v1669_v34 = vadd.f32 %v1668_v50, %v1667_v8  ;;  %v858_v8 = vadd.f32 %v857_v2, %v856_v32  ;;  %v886_v49 = vadd.f32 %v885_v35, %v884_v61 }
 0x268   : > { %v1697_v41 = vadd.f32 %v1696_v15, %v1695_v39  ;;  %1716 = vperm.xlu1 %1957, %v1710_v42   ;;  %v891_v42 = vadd.f32 %v881_v20, %v853_v6  ;;  %v867_v15 = vadd.f32 %v866_v36, %v865_v0  ;;  %v1742_v2 = vmul.f32 %v2049_v48, %v3250_v7 }
 0x269   : > { %2050 = vrcp.f32 %v1704_v40  ;;  %v1670_v21 = vrot.slane %v1669_v34, 2  ;;  %v859_v30 = vrot.slane %v858_v8, 1  ;;  %v887_v50 = vrot.slane %v886_v49, 1 }
 0x26a   : > { %v1698_v58 = vrot.slane %v1697_v41, 2  ;;  %2052 = vrcp.f32 %v890_v22  ;;  %v889_v39 = vadd.f32 %v867_v15, %v839_v26 }
 0x26b   : > { %v1671_v56 = vadd.f32 %v1670_v21, %v1669_v34  ;;  %2054 = vrcp.f32 %v891_v42  ;;  %v860_v12 = vadd.f32 %v859_v30, %v858_v8  ;;  %v888_v33 = vadd.f32 %v887_v50, %v886_v49  ;;  %v3615_v42 = vld [vmem:[#allocation15_spill] sm:$0xff]  ;;  %v3617_v30 = vld [vmem:[#allocation13_spill] sm:$0xff] }
 0x26c   : > { %v1699_v44 = vadd.f32 %v1698_v58, %v1697_v41 }
 0x26d   : > { %v1672_v19 = vrot.slane %v1671_v56, 1  ;;  %v892_v25 = vadd.f32 %v888_v33, %v860_v12  ;;  %v3618_v12 = vld [vmem:[#allocation25_spill] sm:$0xff] }
 0x26e   : > { %v1700_v63 = vrot.slane %v1699_v44, 1 }
 0x26f   : > { %v1673_v47 = vadd.f32 %v1672_v19, %v1671_v56 }
 0x270   : > { %v1701_v29 = vadd.f32 %v1700_v63, %v1699_v44 }
 0x272   : > { %v1705_v10 = vadd.f32 %v1701_v29, %v1673_v47  ;;  %v3614_v47 = vld [vmem:[#allocation14_spill] sm:$0xff]  ;;  %v3616_v29 = vld [vmem:[#allocation32_spill] sm:$0xff] }
 0x274   : > { %2056 = vrcp.f32 %v1705_v10 }
 0x275   : > { %2058 = vrcp.f32 %v889_v39 }
 0x276   : > { %v2051_v34 = vpop.eup %2050  ;;  %2060 = vrcp.f32 %v892_v25 }
 0x277   : > { %v1712_v41 = vmul.f32 %v2051_v34, %v3304_v9  ;;  %v2053_v61 = vpop.eup %2052  ;;  %v1743_v9 = vmul.f32 %v3312_v13, %v3243_v23 }
 0x278   : > { %v898_v44 = vmul.f32 %v2053_v61, %v3292_v27  ;;  %v2055_v18 = vpop.eup %2054  ;;  %v930_v60 = vmul.f32 %v2053_v61, %v3296_v14 }
 0x279   : > { %1726 = vperm.xlu1 %1957, %v1712_v41   ;;  %v899_v37 = vmul.f32 %v2055_v18, %v3280_v31  ;;  %v931_v24 = vmul.f32 %v2055_v18, %v3282_v62  ;;  %v1744_v31 = vmul.f32 %v2051_v34, %v3306_v55  ;;  %v3619_v41 = vld [vmem:[#allocation10_spill] sm:$0xff] }
 0x27d   : > { %1748 = vperm.xlu1 %1957, %v1742_v2  }
 0x281   : > { %v2057_v51 = vpop.eup %2056  ;;  %908 = vperm.xlu1 %1957, %v898_v44   ;;  %v3620_v44 = vld [vmem:[#allocation28_spill] sm:$0xff] }
 0x282   : > { %v1713_v0 = vmul.f32 %v2057_v51, %v3324_v16  ;;  %v2059_v17 = vpop.eup %2058 }
 0x283   : > { %v929_v7 = vmul.f32 %v2059_v17, %v3284_v59  ;;  %v897_v48 = vmul.f32 %v2059_v17, %v3275_v43  ;;  %v2061_v27 = vpop.eup %2060  ;;  %v1745_v59 = vmul.f32 %v2057_v51, %v3326_v11  ;;  %v3348_v43 = vpop.permute.xlu1 %741  ;;  %v3621_v51 = vld [vmem:[#allocation29_spill] sm:$0xff] }
 0x284   : > { %1731 = vperm.xlu0 %1956, %v1713_v0   ;;  %v900_v16 = vmul.f32 %v2061_v27, %v3316_v54  ;;  %v932_v23 = vmul.f32 %v2061_v27, %v3318_v4  ;;  %v1558_v54 = vadd.f32 %v2859_v1, %v3348_v43  ;;  %v1559_v55 = vadd.f32 %v2862_v28, %v3348_v43 }
 0x285   : > { %913 = vperm.xlu1 %1957, %v899_v37   ;;  %v1560_v56 = vadd.f32 %v2853_v5, %v3348_v43  ;;  %v744_v26 = vadd.f32 %v3348_v43, %v2933_v38  ;;  %v745_v8 = vadd.f32 %v3348_v43, %v2937_v45  ;;  %v748_v10 = vadd.f32 %v3348_v43, %v3616_v29 }
 0x286   : > { %v1562_v18 = vadd.f32 %v3620_v44, %v3348_v43  ;;  %v1563_v0 = vadd.f32 %v3621_v51, %v3348_v43 }
 0x288   : > { %1753 = vperm.xlu0 %1956, %v1743_v9  }
 0x289   : > { %935 = vperm.xlu1 %1957, %v929_v7  }
 0x28c   : > { %903 = vperm.xlu0 %1956, %v897_v48  }
 0x28d   : > { %945 = vperm.xlu1 %1957, %v931_v24   ;;  %v3622_v24 = vld [vmem:[#allocation12_spill] sm:$0xff] }
 0x290   : > { %918 = vperm.xlu0 %1956, %v900_v16  }
 0x291   : > { %1758 = vperm.xlu1 %1957, %v1744_v31   ;;  %v3623_v31 = vld [vmem:[#allocation23_spill] sm:$0xff] }
 0x294   : > { %940 = vperm.xlu0 %1956, %v930_v60  }
 0x298   : > { %950 = vperm.xlu0 %1956, %v932_v23   ;;  %v3624_v23 = vld [vmem:[#allocation30_spill] sm:$0xff] }
 0x29c   : > { %1763 = vperm.xlu0 %1956, %v1745_v59   ;;  %v746_v59 = vadd.f32 %v3348_v43, %v3624_v23 }
 0x2d8   : > { %v1722_v11 = vpop.permute.xlu0 %1721 }
 0x2d9   : > { %v1736_v22 = vmul.f32 %v1722_v11, %v1560_v56  ;;  %v3629_v56 = vld [vmem:[#allocation24_spill] sm:$0xff] }
 0x2e3   : > { %v1717_v62 = vpop.permute.xlu1 %1716 }
 0x2e4   : > { %v1734_v14 = vmul.f32 %v1717_v62, %v1558_v54  ;;  %v1735_v40 = vmul.f32 %v1717_v62, %v1559_v55  ;;  %v3625_v62 = vld [vmem:[#allocation31_spill] sm:$0xff] }
 0x2e5   : > { %v747_v54 = vadd.f32 %v3348_v43, %v3625_v62 }
 0x2f4   : > { %v1727_v13 = vpop.permute.xlu1 %1726 }
 0x2f5   : > { %v1738_v48 = vmul.f32 %v1727_v13, %v1562_v18  ;;  %v1739_v27 = vmul.f32 %v1727_v13, %v1563_v0  ;;  %v3626_v13 = vld [vmem:[#allocation11_spill] sm:$0xff] }
 0x2f8   : > { %v1749_v32 = vpop.permute.xlu1 %1748 }
 0x2f9   : > { %v1766_v4 = vmul.f32 %v1749_v32, %v2914_v53  ;;  %v1767_v21 = vmul.f32 %v1749_v32, %v2930_v3  ;;  %v1561_v53 = vadd.f32 %v2856_v57, %v3348_v43 }
 0x2fb   : > { %v1774_v36 = vadd.f32 %v1766_v4, %v1734_v14  ;;  %v1775_v35 = vadd.f32 %v1767_v21, %v1735_v40  ;;  %v1737_v6 = vmul.f32 %v1722_v11, %v1561_v53  ;;  %v3627_v11 = vld [vmem:[#allocation8_spill] sm:$0xff]  ;;  %v751_v53 = vadd.f32 %v3348_v43, %v3629_v56 }
 0x2fc   : > { %v909_v58 = vpop.permute.xlu1 %908 }
 0x2fd   : > { %1782 = vst [vmem:[%s3358_s23 + $0x20] sm:$0xff] %v1774_v36  ;;  %1783 = vst [vmem:[%s3358_s23 + $0x28] sm:$0xff] %v1775_v35  ;;  %v923_v40 = vmul.f32 %v909_v58, %v746_v59  ;;  %v924_v4 = vmul.f32 %v909_v58, %v747_v54  ;;  %v3628_v35 = vld [vmem:[#allocation9_spill] sm:$0xff] }
 0x2ff   : > { %v3362_v1 = vpop.permute.xlu0 %1731 }
 0x300   : > { %v914_v28 = vpop.permute.xlu1 %913 }
 0x301   : > { %v925_v39 = vmul.f32 %v914_v28, %v748_v10 }
 0x303   : > { %v1754_v3 = vpop.permute.xlu0 %1753 }
 0x304   : > { %v1768_v20 = vmul.f32 %v1754_v3, %v2902_v46  ;;  %v1769_v19 = vmul.f32 %v1754_v3, %v2904_v52  ;;  %v936_v63 = vpop.permute.xlu1 %935  ;;  %v749_v46 = vadd.f32 %v3348_v43, %v3617_v30 }
 0x305   : > { %v953_v57 = vmul.f32 %v936_v63, %v3614_v47  ;;  %v954_v15 = vmul.f32 %v936_v63, %v3615_v42  ;;  %v3633_v47 = vld [vmem:[#allocation27_spill] sm:$0xff] }
 0x306   : > { %v1776_v5 = vadd.f32 %v1768_v20, %v1736_v22  ;;  %v1777_v49 = vadd.f32 %v1769_v19, %v1737_v6  ;;  %v926_v34 = vmul.f32 %v914_v28, %v749_v46  ;;  %v750_v28 = vadd.f32 %v3348_v43, %v3628_v35  ;;  %v3630_v19 = vld [vmem:[#allocation16_spill] sm:$0xff]  ;;  %v3634_v46 = vld [vmem:[#allocation18_spill] sm:$0xff] }
 0x307   : > { %v904_v52 = vpop.permute.xlu0 %903 }
 0x308   : > { %1784 = vst [vmem:[%s3358_s23 + $0x60] sm:$0xff] %v1776_v5  ;;  %1785 = vst [vmem:[%s3358_s23 + $0x68] sm:$0xff] %v1777_v49  ;;  %v921_v38 = vmul.f32 %v904_v52, %v744_v26  ;;  %v922_v50 = vmul.f32 %v904_v52, %v745_v8  ;;  %v946_v45 = vpop.permute.xlu1 %945  ;;  %v3631_v26 = vld [vmem:[#allocation17_spill] sm:$0xff]  ;;  %v3632_v5 = vld [vmem:[#allocation26_spill] sm:$0xff] }
 0x309   : > { %v957_v33 = vmul.f32 %v946_v45, %v3618_v12  ;;  %v958_v25 = vmul.f32 %v946_v45, %v3619_v41  ;;  %v1564_v49 = vadd.f32 %v3632_v5, %v3348_v43 }
 0x30a   : > { %v961_v2 = vadd.f32 %v953_v57, %v921_v38  ;;  %v962_v61 = vadd.f32 %v954_v15, %v922_v50  ;;  %v1565_v57 = vadd.f32 %v3633_v47, %v3348_v43  ;;  %v3635_v38 = vld [vmem:[#allocation19_spill] sm:$0xff] }
 0x30b   : > { %v919_v37 = vpop.permute.xlu0 %918  ;;  %v965_v17 = vadd.f32 %v957_v33, %v925_v39  ;;  %v966_v9 = vadd.f32 %v958_v25, %v926_v34  ;;  %v1740_v10 = vmul.f32 %v3362_v1, %v1564_v49 }
 0x30c   : > { %969 = vst [vmem:[%s3358_s23] sm:$0xff] %v961_v2  ;;  %970 = vst [vmem:[%s3358_s23 + $0x8] sm:$0xff] %v962_v61  ;;  %v1759_v7 = vpop.permute.xlu1 %1758  ;;  %v927_v20 = vmul.f32 %v919_v37, %v750_v28  ;;  %v928_v58 = vmul.f32 %v919_v37, %v751_v53  ;;  %v1741_v30 = vmul.f32 %v3362_v1, %v1565_v57 }
 0x30d   : > { %973 = vst [vmem:[%s3358_s23 + $0x10] sm:$0xff] %v965_v17  ;;  %974 = vst [vmem:[%s3358_s23 + $0x18] sm:$0xff] %v966_v9  ;;  %v1770_v16 = vmul.f32 %v1759_v7, %v3622_v24  ;;  %v1771_v60 = vmul.f32 %v1759_v7, %v3623_v31 }
 0x30f   : > { %v941_v55 = vpop.permute.xlu0 %940  ;;  %v1778_v32 = vadd.f32 %v1770_v16, %v1738_v48  ;;  %v1779_v14 = vadd.f32 %v1771_v60, %v1739_v27 }
 0x310   : > { %v955_v21 = vmul.f32 %v941_v55, %v3626_v13  ;;  %v956_v36 = vmul.f32 %v941_v55, %v3627_v11 }
 0x311   : > { %1786 = vst [vmem:[%s3358_s23 + $0x30] sm:$0xff] %v1778_v32  ;;  %1787 = vst [vmem:[%s3358_s23 + $0x38] sm:$0xff] %v1779_v14 }
 0x312   : > { %v963_v3 = vadd.f32 %v955_v21, %v923_v40  ;;  %v964_v22 = vadd.f32 %v956_v36, %v924_v4 }
 0x313   : > { %v951_v6 = vpop.permute.xlu0 %950 }
 0x314   : > { %971 = vst [vmem:[%s3358_s23 + $0x40] sm:$0xff] %v963_v3  ;;  %972 = vst [vmem:[%s3358_s23 + $0x48] sm:$0xff] %v964_v22  ;;  %v959_v63 = vmul.f32 %v951_v6, %v3630_v19  ;;  %v960_v8 = vmul.f32 %v951_v6, %v3631_v26 }
 0x316   : > { %v967_v42 = vadd.f32 %v959_v63, %v927_v20  ;;  %v968_v15 = vadd.f32 %v960_v8, %v928_v58 }
 0x317   : > { %v1764_v29 = vpop.permute.xlu0 %1763 }
 0x318   : > { %975 = vst [vmem:[%s3358_s23 + $0x50] sm:$0xff] %v967_v42  ;;  %976 = vst [vmem:[%s3358_s23 + $0x58] sm:$0xff] %v968_v15  ;;  %v1772_v52 = vmul.f32 %v1764_v29, %v3634_v46  ;;  %v1773_v50 = vmul.f32 %v1764_v29, %v3635_v38 }
 0x31a   : > { %v1780_v43 = vadd.f32 %v1772_v52, %v1740_v10  ;;  %v1781_v45 = vadd.f32 %v1773_v50, %v1741_v30 }
 0x31c   : > { %1788 = vst [vmem:[%s3358_s23 + $0x70] sm:$0xff] %v1780_v43  ;;  %1789 = vst [vmem:[%s3358_s23 + $0x78] sm:$0xff] %v1781_v45 }
 0x31d   : > { %2103 = shalt.err (!%p2100_p10)
}
 0x31e   : > { %s2104_s26 = scalar_lea.hbm %s3425_s8, 2048  ;;  %s2108_s29 = scalar_lea.hbm %s3475_s3, 4096 }
 0x31f   : > { %p2105_p0 = scmp.ne.s32.totalorder %s3425_s8, %s2104_s26  ;;  %p2109_p1 = scmp.lt.s32.totalorder %s3425_s8, %s3475_s3 }
 0x320   : > { %p2110_p3 = scmp.lt.s32.totalorder %s2108_s29, %s2104_s26 }
 0x321   : > { %p2106_p2 = pnand %p2105_p0, %p3636_p12 }
 0x322   : > { %p2111_p6 = por %p2110_p3, %p2109_p1 }
 0x323   : > { %p2107_p9 = pneg %p2106_p2 }
 0x325   : > { %p2112_p11 = pnand %p2111_p6, %p2107_p9 }
 0x327   : > { %2115 = shalt.err (!%p2112_p11)
}
 0x328   : > { %s2161_s11 = smov 512   ;;  %s2162_s23 = smov 32  }
 0x329   : > { %1907 = dma.vmem_to_hbm [thread:$0]  (%p3636_p12), %s3427_s4, 2048, %s3425_s8, %s1791_s16, %s2161_s11, %s2161_s11, %s2162_s23  }
 0x32a PF: > { %s1819_s9 = sand.u32 1, %s2142_s12   ;;  %p3637_p13 = scmp.ne.s32.totalorder %s3523_s25, 0 }
 0x32b   : > { %p3638_p4 = scmp.ge.s32.totalorder %s2154_s15, 2  ;;  %s1820_s6 = scalar_lea.sflag [#allocation4], %s1819_s9 }
 0x32d   : > { %p1914_p5 = pnand %p3638_p4, %p3637_p13 }
 0x32f   : > { %p1915_p7 = pneg %p1914_p5 }
 0x331   : > { %2137 = dma.done.wait (%p1915_p7), %s1820_s6, 2048  }
 0x332   : > { %2139 = vsyncadd (%p1915_p7), %s1820_s6, 4294965248  ;;  %p16_p8 = scmp.ge.s32.totalorder %s2208_s18, 4   ;;  %s3639_s12 = smov %s2146_s13 }
 0x333   : > { %s3640_s13 = smov %s2150_s14  ;;  %s3641_s14 = smov %s2220_s21 }
 0x334   : > { %s3642_s15 = smov %s2208_s18  ;;  %18 = sbr.rel (!%p16_p8) target bundleno = 5 (0x5), region = 77 }
 0x339   :  { %1825 = vsyncpa [#allocation3], 1 }
 0x33a   :  { %1827 = vsyncpa [#allocation3 + $0x1], 1 }
 0x33b   :  { %1828 = vsyncpa [#allocation4], 1 }
 0x33c   :  { %1830 = vsyncpa [#allocation4 + $0x1], 1 }

</bundles_post_ra>
